<compile_context>
chip_gen: v6e
topology: v6e:2x2x1
jax: 0.10.0
libtpu: 0.0.40
codegen_flags: <defaults>
</compile_context>

<pallas_src>
import functools

import jax
import jax.numpy as jnp
from jax.experimental import pallas as pl
from jax.experimental.pallas import tpu as pltpu


def se_gate_mul_kernel(xv_ref, w_ref, x_ref, o_ref):
    # xv_ref: (1, Cin+1)    -- squeeze-excitation vector with trailing 1.0 (bias lane)
    # w_ref : (TC, Cin+1)   -- [weight | bias] tile (1x1 conv == matvec)
    # x_ref : (TC, HW)      -- feature-map tile to be scaled (aliased with o_ref)
    # o_ref : (TC, HW)
    w = w_ref[...].astype(jnp.float32)
    xv = xv_ref[...].astype(jnp.float32)
    # 1x1 conv on 1x1 input == per-output-channel dot over Cin (+ folded bias):
    # VPU multiply + XLU lane-reduce (f32 accumulation), sigmoid on the EUP.
    gate = jnp.sum(w * xv, axis=-1, keepdims=True)          # (TC, 1)
    gate = jax.nn.sigmoid(gate)
    o_ref[...] = (gate * x_ref[...].astype(jnp.float32)).astype(o_ref.dtype)


def fold_conv_bias(weight, bias, dtype=jnp.float32):
    """Precompute [W | b] once at parameter-load time (weights are static)."""
    cout, cin = weight.shape[0], weight.shape[1]
    wm_aug = jnp.concatenate(
        [weight.reshape(cout, cin), bias.reshape(cout, 1)], axis=-1)  # (Cout, Cin+1)
    return wm_aug.astype(dtype)


def pick_tc(cout):
    """Per-chip tile size: 2 grid steps per TensorCore on v7x, 2 total on v5e/v6e."""
    try:
        kind = jax.devices()[0].device_kind.lower()
    except Exception:
        kind = ""
    target = 264 if "v7" in kind else 528
    for tc in (target, 528, 264, 132, 88, 8):
        if cout % tc == 0 and tc % 8 == 0:
            return tc
    return cout


# x278 (positional arg 1) is donated so the in-kernel alias is copy-free.
@functools.partial(jax.jit, static_argnames=("tc",), donate_argnums=(1,))
def se_conv_sigmoid_mul(x281, x278, wm_aug, *, tc=528):
    # x281: (1, Cin, 1, 1); x278: (1, Cout, H, W); wm_aug: (Cout, Cin+1)
    n, cin = x281.shape[0], x281.shape[1]
    _, cout, h, w = x278.shape
    assert n == 1
    hw = h * w
    cin1 = cin + 1
    assert wm_aug.shape == (cout, cin1)
    assert cout % tc == 0 and tc % 8 == 0

    # Per-call work kept minimal: only the 45-float excitation vector concat.
    xv_aug = jnp.concatenate(
        [x281.reshape(1, cin), jnp.ones((1, 1), x281.dtype)], axis=-1)    # (1, Cin+1)
    xm = x278.reshape(cout, hw)                                           # (Cout, HW)

    itemsize = jnp.dtype(x278.dtype).itemsize
    cost = pl.CostEstimate(
        flops=2 * cout * cin1 + cout * hw,
        transcendentals=cout,
        bytes_accessed=(2 * cout * hw) * itemsize + (cout * cin1 + cin1) * 4,
    )

    out = pl.pallas_call(
        se_gate_mul_kernel,
        out_shape=jax.ShapeDtypeStruct((cout, hw), x278.dtype),
        grid_spec=pltpu.PrefetchScalarGridSpec(
            num_scalar_prefetch=0,
            grid=(cout // tc,),
            in_specs=[
                pl.BlockSpec((1, cin1), lambda i: (0, 0)),     # excitation vec (replicated)
                pl.BlockSpec((tc, cin1), lambda i: (i, 0)),    # [weight | bias] tile
                pl.BlockSpec((tc, hw), lambda i: (i, 0)),      # feature-map tile
            ],
            out_specs=pl.BlockSpec((tc, hw), lambda i: (i, 0)),
        ),
        # xm (input index 2) has identical shape/dtype to the output and is
        # donated at the jit boundary -> true in-place update, no extra HBM pass.
        input_output_aliases={2: 0},
        cost_estimate=cost,
        compiler_params=pltpu.CompilerParams(
            dimension_semantics=("parallel",)),
    )(xv_aug, wm_aug, xm)

    return out.reshape(1, cout, h, w)


if __name__ == "__main__":
    # Module shapes: Conv2d(44 -> 1056, 1x1); x281: (1,44,1,1); x278: (1,1056,14,14)
    cin, cout, h, w = 44, 1056, 14, 14

    key = jax.random.PRNGKey(0)
    k1, k2, k3, k4 = jax.random.split(key, 4)

    x278 = jax.random.normal(k1, (1, cout, h, w), dtype=jnp.float32)
    x281 = jax.random.normal(k2, (1, cin, 1, 1), dtype=jnp.float32)

    # Deterministic parameter init (loosely matches PyTorch Conv2d default ranges).
    bound = 1.0 / (cin ** 0.5)
    weight = jax.random.uniform(k3, (cout, cin, 1, 1), jnp.float32, -bound, bound)
    bias = jax.random.uniform(k4, (cout,), jnp.float32, -bound, bound)

    # Plain-JAX reference computed BEFORE the kernel call (x278 is donated).
    gate_ref = jnp.einsum("oi,i->o", weight.reshape(cout, cin), x281.reshape(cin)) + bias
    ref = jax.nn.sigmoid(gate_ref).reshape(1, cout, 1, 1) * x278
    ref = jax.block_until_ready(ref)

    # Static param prep (once at load time) + per-chip tile selection.
    wm_aug = fold_conv_bias(weight, bias, dtype=x278.dtype)
    tc = pick_tc(cout)

    out = se_conv_sigmoid_mul(x281, x278, wm_aug, tc=tc)
    out = jax.block_until_ready(out)

    assert out.shape == (1, cout, h, w)
    assert jnp.allclose(out, ref, atol=1e-5, rtol=1e-5)

    print("KERNEL_OK")
</pallas_src>

<mosaic_0001>
module attributes {stable_mosaic.version = 11 : i64} {
  func.func @se_gate_mul_kernel(%arg0: i32, %arg1: memref<1x45xf32, #tpu.memory_space<vmem>>, %arg2: memref<528x45xf32, #tpu.memory_space<vmem>>, %arg3: memref<528x196xf32, #tpu.memory_space<vmem>>, %arg4: memref<528x196xf32, #tpu.memory_space<vmem>>) attributes {dimension_semantics = [#tpu.dimension_semantics<parallel>], iteration_bounds = array<i64: 2>, scalar_prefetch = 0 : i64, scratch_operands = 0 : i64, tpu.core_type = #tpu.core_type<tc>, window_params = [{pipeline_mode = #tpu.pipeline_mode<synchronous>, transform_indices = @transform_0, window_bounds = array<i64: 1, 45>}, {transform_indices = @transform_1, window_bounds = array<i64: 528, 45>}, {transform_indices = @transform_2, window_bounds = array<i64: 528, 196>}, {transform_indices = @transform_3, window_bounds = array<i64: 528, 196>}]} {
    %c0 = arith.constant 0 : index
    %c0_0 = arith.constant 0 : index
    %0 = vector.load %arg2[%c0, %c0_0] : memref<528x45xf32, #tpu.memory_space<vmem>>, vector<528x45xf32>
    %c0_1 = arith.constant 0 : index
    %c0_2 = arith.constant 0 : index
    %1 = vector.load %arg1[%c0_1, %c0_2] : memref<1x45xf32, #tpu.memory_space<vmem>>, vector<1x45xf32>
    %2 = vector.broadcast %1 : vector<1x45xf32> to vector<528x45xf32>
    %3 = arith.mulf %0, %2 : vector<528x45xf32>
    %cst = arith.constant dense<0.000000e+00> : vector<528xf32>
    %4 = vector.multi_reduction <add>, %3, %cst [1] : vector<528x45xf32> to vector<528xf32>
    %5 = vector.shape_cast %4 : vector<528xf32> to vector<528x1xf32>
    %6 = arith.negf %5 : vector<528x1xf32>
    %7 = math.exp %6 : vector<528x1xf32>
    %cst_3 = arith.constant 1.000000e+00 : f32
    %8 = vector.broadcast %cst_3 : f32 to vector<528x1xf32>
    %9 = arith.addf %8, %7 : vector<528x1xf32>
    %10 = arith.divf %8, %9 : vector<528x1xf32>
    %c0_4 = arith.constant 0 : index
    %c0_5 = arith.constant 0 : index
    %11 = vector.load %arg3[%c0_4, %c0_5] : memref<528x196xf32, #tpu.memory_space<vmem>>, vector<528x196xf32>
    %12 = vector.broadcast %10 : vector<528x1xf32> to vector<528x196xf32>
    %13 = arith.mulf %12, %11 : vector<528x196xf32>
    %c0_6 = arith.constant 0 : index
    %c0_7 = arith.constant 0 : index
    %14 = vector.load %arg4[%c0_6, %c0_7] : memref<528x196xf32, #tpu.memory_space<vmem>>, vector<528x196xf32>
    tpu.vector_store %arg4[%c0_6, %c0_7], %13 {strides = array<i32>} : memref<528x196xf32, #tpu.memory_space<vmem>>, vector<528x196xf32>,
    return
  }
  func.func @transform_0(%arg0: i32) -> (i32, i32) {
    %c0_i32 = arith.constant 0 : i32
    %c0_i32_0 = arith.constant 0 : i32
    %c0_i32_1 = arith.constant 0 : i32
    return %c0_i32, %c0_i32_0 : i32, i32
  }
  func.func @transform_1(%arg0: i32) -> (i32, i32) {
    %c0_i32 = arith.constant 0 : i32
    %c0_i32_0 = arith.constant 0 : i32
    return %arg0, %c0_i32 : i32, i32
  }
  func.func @transform_2(%arg0: i32) -> (i32, i32) {
    %c0_i32 = arith.constant 0 : i32
    %c0_i32_0 = arith.constant 0 : i32
    return %arg0, %c0_i32 : i32, i32
  }
  func.func @transform_3(%arg0: i32) -> (i32, i32) {
    %c0_i32 = arith.constant 0 : i32
    %c0_i32_0 = arith.constant 0 : i32
    return %arg0, %c0_i32 : i32, i32
  }
}

</mosaic_0001>

<bundles_post_ra>
// kernel: se_conv_sigmoid_mul.1
= control target key start
LH: loop header
LB: loop body
LE: loop exit
PB: predicated region body
PF: predicated region fallthrough
CT: control target
= control target key end

     0   :  { %s1783_s12 = smov 0   ;;  %s2884_s0 = inlined_call_operand.vmem [shape: f32[1,45], index: 0, kind: input, shape index: {}]   ;;  %s2885_s1 = inlined_call_operand.vmem [shape: f32[1056,45], index: 1, kind: input, shape index: {}]   ;;  %s2886_s2 = inlined_call_operand.vmem [shape: f32[1056,196], index: 2, kind: input, shape index: {}, may-alias: {2,3}]   ;;  %s2887_s3 = inlined_call_operand.vmem [shape: f32[1056,196], index: 3, kind: output, shape index: {}, may-alias: {2,3}]  }
   0x1 LB: > { %s1402_s13 = sadd.s32 4294967295, %s1761_s12   ;;  %p1406_p0 = scmp.ge.s32.totalorder %s1761_s12, 1  ;;  %s1761_s12 = sphi %s1783_s12, %s13_s12  }
   0x2   : > { %p150_p1 = scmp.lt.s32.totalorder %s1761_s12, 3 }
   0x4   : > { %p151_p2 = pnand %p1406_p0, %p150_p1 }
   0x6   : > { %154 = sbr.rel (%p151_p2) target bundleno = 359 (0x167), region = 32 }
   0xb   : > { %s181_s14 = smul.u32 66, %s1402_s13  ;;  %v1797_v0 = vld [vmem:[%s2884_s0] ss:$0 sm:$0xff]  ;;  %vm340_vm0 = vcmask 367616   ;;  %vm1200_vm1 = vcmask 556032  }
   0xd   : > { %p182_p3 = scmp.lt.s32.totalorder %s181_s14, 131 }
   0xf   : > { %s3055_s14 = smov (!%p182_p3, %s181_s14), 131 }
  0x10   : > { %s1407_s15 = sshll.u32 %s3055_s14, 3  ;;  %s1481_s21 = sshll.u32 %s3055_s14, 4 }
  0x11   : > { %s1802_s20 = scalar_lea.vmem %s2885_s1, %s1407_s15  ;;  %s2134_s24 = scalar_lea.vmem %s2886_s2, %s1481_s21 }
  0x12   : > { %v203_v1 = vld [vmem:[%s1802_s20 + $0x10] sm:$0xff]  ;;  %v201_v2 = vld [vmem:[%s1802_s20] sm:$0xff]  ;;  %v204_v3 = vld [vmem:[%s1802_s20 + $0x18] sm:$0xff]  ;;  %s2537_s27 = scalar_lea.vmem %s2887_s3, %s1481_s21 }
  0x13   : > { %v276_v4 = vmul.f32 %v1797_v0, %v203_v1  ;;  %v274_v5 = vmul.f32 %v1797_v0, %v201_v2  ;;  %v277_v6 = vmul.f32 %v1797_v0, %v204_v3  ;;  %v202_v7 = vld [vmem:[%s1802_s20 + $0x8] sm:$0xff]  ;;  %v205_v10 = vld [vmem:[%s1802_s20 + $0x20] sm:$0xff]  ;;  %v208_v17 = vld [vmem:[%s1802_s20 + $0x38] sm:$0xff] }
  0x14   : > { %v275_v8 = vmul.f32 %v1797_v0, %v202_v7  ;;  %v206_v9 = vld [vmem:[%s1802_s20 + $0x28] sm:$0xff]  ;;  %v278_v16 = vmul.f32 %v1797_v0, %v205_v10  ;;  %v207_v18 = vld [vmem:[%s1802_s20 + $0x30] sm:$0xff]  ;;  %v209_v20 = vld [vmem:[%s1802_s20 + $0x40] sm:$0xff]  ;;  %v281_v27 = vmul.f32 %v1797_v0, %v208_v17 }
  0x15   : > { %v347_v11 = vsel %vm340_vm0, %v276_v4, 0.0  ;;  %v341_v12 = vsel %vm340_vm0, %v274_v5, 0.0  ;;  %v350_v13 = vsel %vm340_vm0, %v277_v6, 0.0  ;;  %v279_v15 = vmul.f32 %v1797_v0, %v206_v9  ;;  %v210_v19 = vld [vmem:[%s1802_s20 + $0x48] sm:$0xff]  ;;  %v212_v21 = vld [vmem:[%s1802_s20 + $0x58] sm:$0xff]  ;;  %v211_v22 = vld [vmem:[%s1802_s20 + $0x50] sm:$0xff] }
  0x16   : > { %348 = vadd.xlane.f32.xlu1 %v347_v11  ;;  %342 = vadd.xlane.f32.xlu0 %v341_v12  ;;  %v344_v14 = vsel %vm340_vm0, %v275_v8, 0.0  ;;  %v214_v23 = vld [vmem:[%s1802_s20 + $0x68] sm:$0xff]  ;;  %v213_v24 = vld [vmem:[%s1802_s20 + $0x60] sm:$0xff]  ;;  %v353_v26 = vsel %vm340_vm0, %v278_v16, 0.0  ;;  %v280_v28 = vmul.f32 %v1797_v0, %v207_v18  ;;  %v216_v29 = vld [vmem:[%s1802_s20 + $0x78] sm:$0xff]  ;;  %v283_v31 = vmul.f32 %v1797_v0, %v210_v19 }
  0x17   : > { %v356_v25 = vsel %vm340_vm0, %v279_v15, 0.0  ;;  %v215_v30 = vld [vmem:[%s1802_s20 + $0x70] sm:$0xff]  ;;  %v282_v32 = vmul.f32 %v1797_v0, %v209_v20  ;;  %v285_v33 = vmul.f32 %v1797_v0, %v212_v21  ;;  %v284_v34 = vmul.f32 %v1797_v0, %v211_v22  ;;  %v218_v37 = vld [vmem:[%s1802_s20 + $0x88] sm:$0xff]  ;;  %v217_v42 = vld [vmem:[%s1802_s20 + $0x80] sm:$0xff] }
  0x18   : > { %v287_v35 = vmul.f32 %v1797_v0, %v214_v23  ;;  %v286_v36 = vmul.f32 %v1797_v0, %v213_v24  ;;  %v289_v38 = vmul.f32 %v1797_v0, %v216_v29  ;;  %v288_v39 = vmul.f32 %v1797_v0, %v215_v30  ;;  %v220_v43 = vld [vmem:[%s1802_s20 + $0x98] sm:$0xff]  ;;  %v219_v44 = vld [vmem:[%s1802_s20 + $0x90] sm:$0xff]  ;;  %v234_v49 = vld [vmem:[%s1802_s20 + $0x108] sm:$0xff] }
  0x19   : > { %v362_v40 = vsel %vm340_vm0, %v281_v27, 0.0  ;;  %v359_v41 = vsel %vm340_vm0, %v280_v28, 0.0  ;;  %v368_v45 = vsel %vm340_vm0, %v283_v31, 0.0  ;;  %v365_v46 = vsel %vm340_vm0, %v282_v32, 0.0  ;;  %v233_v50 = vld [vmem:[%s1802_s20 + $0x100] sm:$0xff]  ;;  %v236_v51 = vld [vmem:[%s1802_s20 + $0x118] sm:$0xff] }
  0x1a   : > { %351 = vadd.xlane.f32.xlu1 %v350_v13  ;;  %345 = vadd.xlane.f32.xlu0 %v344_v14  ;;  %v374_v47 = vsel %vm340_vm0, %v285_v33, 0.0  ;;  %v291_v48 = vmul.f32 %v1797_v0, %v218_v37  ;;  %v371_v52 = vsel %vm340_vm0, %v284_v34, 0.0  ;;  %v1857_v53 = vsel %vm340_vm0, %v287_v35, 0.0  ;;  %v235_v55 = vld [vmem:[%s1802_s20 + $0x110] sm:$0xff]  ;;  %v238_v56 = vld [vmem:[%s1802_s20 + $0x128] sm:$0xff]  ;;  %v237_v57 = vld [vmem:[%s1802_s20 + $0x120] sm:$0xff] }
  0x1b   : > { %v1860_v54 = vsel %vm340_vm0, %v286_v36, 0.0  ;;  %v1866_v58 = vsel %vm340_vm0, %v289_v38, 0.0  ;;  %v1869_v59 = vsel %vm340_vm0, %v288_v39, 0.0  ;;  %v1872_v60 = vmul.f32 %v1797_v0, %v217_v42  ;;  %v240_v62 = vld [vmem:[%s1802_s20 + $0x138] sm:$0xff]  ;;  %v239_v4 = vld [vmem:[%s1802_s20 + $0x130] sm:$0xff]  ;;  %v242_v9 = vld [vmem:[%s1802_s20 + $0x148] sm:$0xff] }
  0x1c   : > { %v1875_v61 = vmul.f32 %v1797_v0, %v220_v43  ;;  %v1879_v63 = vmul.f32 %v1797_v0, %v219_v44  ;;  %v307_v1 = vmul.f32 %v1797_v0, %v234_v49  ;;  %v306_v2 = vmul.f32 %v1797_v0, %v233_v50  ;;  %v241_v10 = vld [vmem:[%s1802_s20 + $0x140] sm:$0xff]  ;;  %v244_v11 = vld [vmem:[%s1802_s20 + $0x158] sm:$0xff]  ;;  %v243_v16 = vld [vmem:[%s1802_s20 + $0x150] sm:$0xff] }
  0x1d   : > { %v309_v3 = vmul.f32 %v1797_v0, %v236_v51  ;;  %v1886_v5 = vsel %vm340_vm0, %v291_v48, 0.0  ;;  %v308_v6 = vmul.f32 %v1797_v0, %v235_v55  ;;  %v311_v7 = vmul.f32 %v1797_v0, %v238_v56  ;;  %v246_v17 = vld [vmem:[%s1802_s20 + $0x168] sm:$0xff]  ;;  %v245_v18 = vld [vmem:[%s1802_s20 + $0x160] sm:$0xff]  ;;  %v248_v23 = vld [vmem:[%s1802_s20 + $0x178] sm:$0xff] }
  0x1e   : > { %357 = vadd.xlane.f32.xlu1 %v356_v25  ;;  %354 = vadd.xlane.f32.xlu0 %v353_v26  ;;  %v310_v8 = vmul.f32 %v1797_v0, %v237_v57  ;;  %v1895_v12 = vsel %vm340_vm0, %v307_v1, 0.0  ;;  %v1898_v13 = vsel %vm340_vm0, %v306_v2, 0.0  ;;  %v313_v15 = vmul.f32 %v1797_v0, %v240_v62  ;;  %v247_v28 = vld [vmem:[%s1802_s20 + $0x170] sm:$0xff]  ;;  %v250_v33 = vld [vmem:[%s1802_s20 + $0x188] sm:$0xff]  ;;  %v249_v34 = vld [vmem:[%s1802_s20 + $0x180] sm:$0xff] }
  0x1f   : > { %v1901_v14 = vsel %vm340_vm0, %v309_v3, 0.0  ;;  %v1908_v19 = vsel %vm340_vm0, %v308_v6, 0.0  ;;  %v1911_v20 = vsel %vm340_vm0, %v311_v7, 0.0  ;;  %v312_v22 = vmul.f32 %v1797_v0, %v239_v4  ;;  %v252_v35 = vld [vmem:[%s1802_s20 + $0x198] sm:$0xff]  ;;  %v253_v42 = vld [vmem:[%s1802_s20 + $0x1a0] sm:$0xff]  ;;  %v258_v1 = vld [vmem:[%s1802_s20 + $0x1c8] sm:$0xff] }
  0x20   : > { %v1914_v21 = vsel %vm340_vm0, %v310_v8, 0.0  ;;  %v1919_v24 = vsel %vm340_vm0, %v313_v15, 0.0  ;;  %v315_v25 = vmul.f32 %v1797_v0, %v242_v9  ;;  %v314_v26 = vmul.f32 %v1797_v0, %v241_v10  ;;  %v256_v48 = vld [vmem:[%s1802_s20 + $0x1b8] sm:$0xff]  ;;  %v257_v2 = vld [vmem:[%s1802_s20 + $0x1c0] sm:$0xff]  ;;  %v259_v9 = vld [vmem:[%s1802_s20 + $0x1d0] sm:$0xff] }
  0x21   : > { %v317_v27 = vmul.f32 %v1797_v0, %v244_v11  ;;  %v1926_v29 = vsel %vm340_vm0, %v312_v22, 0.0  ;;  %v316_v30 = vmul.f32 %v1797_v0, %v243_v16  ;;  %v319_v31 = vmul.f32 %v1797_v0, %v246_v17  ;;  %v260_v3 = vld [vmem:[%s1802_s20 + $0x1d8] sm:$0xff]  ;;  %v262_v10 = vld [vmem:[%s1802_s20 + $0x1e8] sm:$0xff]  ;;  %v261_v11 = vld [vmem:[%s1802_s20 + $0x1e0] sm:$0xff] }
  0x22   : > { %363 = vadd.xlane.f32.xlu1 %v362_v40  ;;  %360 = vadd.xlane.f32.xlu0 %v359_v41  ;;  %v318_v32 = vmul.f32 %v1797_v0, %v245_v18  ;;  %v1935_v36 = vsel %vm340_vm0, %v315_v25, 0.0  ;;  %v1938_v37 = vsel %vm340_vm0, %v314_v26, 0.0  ;;  %v321_v39 = vmul.f32 %v1797_v0, %v248_v23  ;;  %v251_v40 = vld [vmem:[%s1802_s20 + $0x190] sm:$0xff]  ;;  %v254_v41 = vld [vmem:[%s1802_s20 + $0x1a8] sm:$0xff]  ;;  %v264_v22 = vld [vmem:[%s1802_s20 + $0x1f8] sm:$0xff] }
  0x23   : > { %v1941_v38 = vsel %vm340_vm0, %v317_v27, 0.0  ;;  %v1948_v43 = vsel %vm340_vm0, %v316_v30, 0.0  ;;  %v1951_v44 = vsel %vm340_vm0, %v319_v31, 0.0  ;;  %v322_v50 = vmul.f32 %v1797_v0, %v249_v34  ;;  %v263_v26 = vld [vmem:[%s1802_s20 + $0x1f0] sm:$0xff] }
  0x24   : > { %v1959_v49 = vsel %vm340_vm0, %v321_v39, 0.0  ;;  %v325_v51 = vmul.f32 %v1797_v0, %v252_v35  ;;  %v324_v56 = vmul.f32 %v1797_v0, %v251_v40  ;;  %v327_v57 = vmul.f32 %v1797_v0, %v254_v41 }
  0x25   : > { %v326_v62 = vmul.f32 %v1797_v0, %v253_v42  ;;  %v1978_v6 = vsel %vm340_vm0, %v322_v50, 0.0  ;;  %v329_v8 = vmul.f32 %v1797_v0, %v256_v48  ;;  %v333_v25 = vmul.f32 %v1797_v0, %v260_v3 }
  0x26   : > { %369 = vadd.xlane.f32.xlu1 %v368_v45  ;;  %366 = vadd.xlane.f32.xlu0 %v365_v46  ;;  %v1954_v45 = vsel %vm340_vm0, %v318_v32, 0.0  ;;  %v320_v46 = vmul.f32 %v1797_v0, %v247_v28  ;;  %v1981_v7 = vsel %vm340_vm0, %v325_v51, 0.0  ;;  %v1990_v15 = vsel %vm340_vm0, %v324_v56, 0.0  ;;  %v266_v32 = vld [vmem:[%s1802_s20 + $0x208] sm:$0xff] }
  0x27   : > { %v1993_v16 = vsel %vm340_vm0, %v327_v57, 0.0  ;;  %v1996_v17 = vsel %vm340_vm0, %v326_v62, 0.0  ;;  %v2001_v23 = vsel %vm340_vm0, %v329_v8, 0.0  ;;  %v332_v28 = vmul.f32 %v1797_v0, %v259_v9  ;;  %v222_v51 = vld [vmem:[%s1802_s20 + $0xa8] sm:$0xff]  ;;  %v224_v8 = vld [vmem:[%s1802_s20 + $0xb8] sm:$0xff]  ;;  %v223_v9 = vld [vmem:[%s1802_s20 + $0xb0] sm:$0xff] }
  0x28   : > { %v1966_v55 = vsel %vm340_vm0, %v320_v46, 0.0  ;;  %v335_v30 = vmul.f32 %v1797_v0, %v262_v10  ;;  %v334_v31 = vmul.f32 %v1797_v0, %v261_v11  ;;  %v2022_v39 = vsel %vm340_vm0, %v333_v25, 0.0 }
  0x29   : > { %v337_v40 = vmul.f32 %v1797_v0, %v264_v22  ;;  %v2028_v41 = vsel %vm340_vm0, %v332_v28, 0.0  ;;  %v336_v48 = vmul.f32 %v1797_v0, %v263_v26  ;;  %v297_v11 = vmul.f32 %v1797_v0, %v224_v8  ;;  %v228_v26 = vld [vmem:[%s1802_s20 + $0xd8] sm:$0xff]  ;;  %v227_v28 = vld [vmem:[%s1802_s20 + $0xd0] sm:$0xff] }
  0x2a   : > { %375 = vadd.xlane.f32.xlu1 %v374_v47  ;;  %372 = vadd.xlane.f32.xlu0 %v371_v52  ;;  %v323_v47 = vmul.f32 %v1797_v0, %v250_v33  ;;  %v255_v52 = vld [vmem:[%s1802_s20 + $0x1b0] sm:$0xff]  ;;  %v265_v33 = vld [vmem:[%s1802_s20 + $0x200] sm:$0xff]  ;;  %v2031_v42 = vsel %vm340_vm0, %v335_v30, 0.0  ;;  %v2034_v46 = vsel %vm340_vm0, %v334_v31, 0.0 }
  0x2b   : > { %v328_v18 = vmul.f32 %v1797_v0, %v255_v52  ;;  %v338_v50 = vmul.f32 %v1797_v0, %v265_v33  ;;  %v221_v52 = vld [vmem:[%s1802_s20 + $0xa0] sm:$0xff]  ;;  %v2047_v56 = vsel %vm340_vm0, %v336_v48, 0.0  ;;  %v410_v22 = vsel %vm340_vm0, %v297_v11, 0.0 }
  0x2c   : > { %v1975_v4 = vsel %vm340_vm0, %v323_v47, 0.0  ;;  %v389_v47 = vsel %vm340_vm0, %v1872_v60, 0.0  ;;  %v398_v60 = vsel %vm340_vm0, %v1875_v61, 0.0  ;;  %v294_v3 = vmul.f32 %v1797_v0, %v221_v52  ;;  %v229_v48 = vld [vmem:[%s1802_s20 + $0xe0] sm:$0xff]  ;;  %v232_v52 = vld [vmem:[%s1802_s20 + $0xf8] sm:$0xff] }
  0x2d   : > { %v2008_v27 = vsel %vm340_vm0, %v328_v18, 0.0  ;;  %v2053_v62 = vsel %vm340_vm0, %v338_v50, 0.0  ;;  %v296_v61 = vmul.f32 %v1797_v0, %v223_v9  ;;  %v226_v18 = vld [vmem:[%s1802_s20 + $0xc8] sm:$0xff]  ;;  %v300_v33 = vmul.f32 %v1797_v0, %v227_v28 }
  0x2e   : > { %381 = vadd.xlane.f32.xlu1 %v1857_v53  ;;  %378 = vadd.xlane.f32.xlu0 %v1860_v54  ;;  %v331_v53 = vmul.f32 %v1797_v0, %v258_v1  ;;  %v330_v54 = vmul.f32 %v1797_v0, %v257_v2  ;;  %v395_v1 = vsel %vm340_vm0, %v1879_v63, 0.0  ;;  %v295_v2 = vmul.f32 %v1797_v0, %v222_v51  ;;  %v225_v63 = vld [vmem:[%s1802_s20 + $0xc0] sm:$0xff]  ;;  %v2140_v28 = vld [vmem:[%s2134_s24 + $0x28] sm:$0xff] }
  0x2f   : > { %v298_v25 = vmul.f32 %v1797_v0, %v225_v63  ;;  %v302_v51 = vmul.f32 %v1797_v0, %v229_v48  ;;  %v2156_v48 = vld [vmem:[%s2134_s24 + $0x38] sm:$0xff] }
  0x30   : > { %v2016_v34 = vsel %vm340_vm0, %v331_v53, 0.0  ;;  %v2019_v35 = vsel %vm340_vm0, %v330_v54, 0.0  ;;  %v404_v10 = vsel %vm340_vm0, %v295_v2, 0.0  ;;  %v407_v53 = vsel %vm340_vm0, %v296_v61, 0.0 }
  0x31   : > { %v299_v54 = vmul.f32 %v1797_v0, %v226_v18  ;;  %v413_v31 = vsel %vm340_vm0, %v298_v25, 0.0  ;;  %v425_v2 = vsel %vm340_vm0, %v302_v51, 0.0  ;;  %v2168_v51 = vld [vmem:[%s2134_s24 + $0x58] sm:$0xff] }
  0x32   : > { %387 = vadd.xlane.f32.xlu1 %v1866_v58  ;;  %384 = vadd.xlane.f32.xlu0 %v1869_v59  ;;  %v2040_v58 = vsel %vm340_vm0, %v337_v40, 0.0  ;;  %v339_v59 = vmul.f32 %v1797_v0, %v266_v32  ;;  %v301_v32 = vmul.f32 %v1797_v0, %v228_v26  ;;  %v230_v40 = vld [vmem:[%s1802_s20 + $0xe8] sm:$0xff] }
  0x33   : > { %v416_v30 = vsel %vm340_vm0, %v299_v54, 0.0  ;;  %v303_v50 = vmul.f32 %v1797_v0, %v230_v40  ;;  %v2153_v40 = vld [vmem:[%s2134_s24 + $0x30] sm:$0xff] }
  0x34   : > { %v2050_v57 = vsel %vm340_vm0, %v339_v59, 0.0  ;;  %v419_v59 = vsel %vm340_vm0, %v300_v33, 0.0 }
  0x36   : > { %393 = vadd.xlane.f32.xlu1 %v1886_v5  ;;  %390 = vadd.xlane.f32.xlu0 %v389_v47  ;;  %v401_v5 = vsel %vm340_vm0, %v294_v3, 0.0  ;;  %v422_v47 = vsel %vm340_vm0, %v301_v32, 0.0  ;;  %v305_v3 = vmul.f32 %v1797_v0, %v232_v52  ;;  %v2171_v52 = vld [vmem:[%s2134_s24 + $0x40] sm:$0xff] }
  0x38   : > { %v434_v9 = vsel %vm340_vm0, %v305_v3, 0.0  ;;  %v2183_v3 = vld [vmem:[%s2134_s24 + $0x60] sm:$0xff] }
  0x3a   : > { %399 = vadd.xlane.f32.xlu1 %v398_v60  ;;  %396 = vadd.xlane.f32.xlu0 %v395_v1  ;;  %v231_v60 = vld [vmem:[%s1802_s20 + $0xf0] sm:$0xff]  ;;  %v428_v1 = vsel %vm340_vm0, %v303_v50, 0.0 }
  0x3b   : > { %v304_v8 = vmul.f32 %v1797_v0, %v231_v60  ;;  %v2165_v50 = vld [vmem:[%s2134_s24 + $0x50] sm:$0xff]  ;;  %v2174_v60 = vld [vmem:[%s2134_s24 + $0x48] sm:$0xff] }
  0x3e   : > { %405 = vadd.xlane.f32.xlu1 %v404_v10  ;;  %402 = vadd.xlane.f32.xlu0 %v401_v5  ;;  %v431_v10 = vsel %vm340_vm0, %v304_v8, 0.0  ;;  %v2186_v8 = vld [vmem:[%s2134_s24 + $0x68] sm:$0xff] }
  0x42   : > { %411 = vadd.xlane.f32.xlu1 %v410_v22  ;;  %408 = vadd.xlane.f32.xlu0 %v407_v53  ;;  %v2137_v53 = vld [vmem:[%s2134_s24 + $0x20] sm:$0xff] }
  0x46   : > { %417 = vadd.xlane.f32.xlu1 %v416_v30  ;;  %414 = vadd.xlane.f32.xlu0 %v413_v31  ;;  %v2143_v30 = vld [vmem:[%s2134_s24] sm:$0xff]  ;;  %v2146_v31 = vld [vmem:[%s2134_s24 + $0x8] sm:$0xff] }
  0x4a   : > { %423 = vadd.xlane.f32.xlu1 %v422_v47  ;;  %420 = vadd.xlane.f32.xlu0 %v419_v59  ;;  %v2159_v47 = vld [vmem:[%s2134_s24 + $0x10] sm:$0xff]  ;;  %v2162_v59 = vld [vmem:[%s2134_s24 + $0x18] sm:$0xff] }
  0x4e   : > { %429 = vadd.xlane.f32.xlu1 %v428_v1  ;;  %426 = vadd.xlane.f32.xlu0 %v425_v2  ;;  %v2177_v1 = vld [vmem:[%s2134_s24 + $0x70] sm:$0xff]  ;;  %v2180_v2 = vld [vmem:[%s2134_s24 + $0x78] sm:$0xff] }
  0x52   : > { %435 = vadd.xlane.f32.xlu1 %v434_v9  ;;  %432 = vadd.xlane.f32.xlu0 %v431_v10  ;;  %v2191_v10 = vld [vmem:[%s2134_s24 + $0x90] sm:$0xff] }
  0x56   : > { %441 = vadd.xlane.f32.xlu1 %v1895_v12  ;;  %438 = vadd.xlane.f32.xlu0 %v1898_v13 }
  0x5a   : > { %447 = vadd.xlane.f32.xlu1 %v1901_v14  ;;  %444 = vadd.xlane.f32.xlu0 %v1908_v19 }
  0x5e   : > { %453 = vadd.xlane.f32.xlu1 %v1911_v20  ;;  %450 = vadd.xlane.f32.xlu0 %v1914_v21 }
  0x62   : > { %459 = vadd.xlane.f32.xlu1 %v1919_v24  ;;  %456 = vadd.xlane.f32.xlu0 %v1926_v29 }
  0x66   : > { %465 = vadd.xlane.f32.xlu1 %v1935_v36  ;;  %462 = vadd.xlane.f32.xlu0 %v1938_v37 }
  0x6a   : > { %471 = vadd.xlane.f32.xlu1 %v1941_v38  ;;  %468 = vadd.xlane.f32.xlu0 %v1948_v43 }
  0x6e   : > { %477 = vadd.xlane.f32.xlu1 %v1951_v44  ;;  %474 = vadd.xlane.f32.xlu0 %v1954_v45 }
  0x72   : > { %483 = vadd.xlane.f32.xlu1 %v1959_v49  ;;  %480 = vadd.xlane.f32.xlu0 %v1966_v55 }
  0x76   : > { %489 = vadd.xlane.f32.xlu1 %v1975_v4  ;;  %486 = vadd.xlane.f32.xlu0 %v1978_v6 }
  0x7a   : > { %495 = vadd.xlane.f32.xlu1 %v1981_v7  ;;  %492 = vadd.xlane.f32.xlu0 %v1990_v15 }
  0x7e   : > { %501 = vadd.xlane.f32.xlu1 %v1993_v16  ;;  %498 = vadd.xlane.f32.xlu0 %v1996_v17 }
  0x82   : > { %507 = vadd.xlane.f32.xlu1 %v2001_v23  ;;  %504 = vadd.xlane.f32.xlu0 %v2008_v27 }
  0x86   : > { %513 = vadd.xlane.f32.xlu1 %v2016_v34  ;;  %510 = vadd.xlane.f32.xlu0 %v2019_v35 }
  0x8a   : > { %519 = vadd.xlane.f32.xlu1 %v2022_v39  ;;  %516 = vadd.xlane.f32.xlu0 %v2028_v41 }
  0x8e   : > { %525 = vadd.xlane.f32.xlu1 %v2031_v42  ;;  %522 = vadd.xlane.f32.xlu0 %v2034_v46 }
  0x92   : > { %531 = vadd.xlane.f32.xlu1 %v2040_v58  ;;  %528 = vadd.xlane.f32.xlu0 %v2047_v56 }
  0x96   : > { %537 = vadd.xlane.f32.xlu1 %v2050_v57  ;;  %534 = vadd.xlane.f32.xlu0 %v2053_v62 }
  0x9f   : > { %v349_v0 = vpop.xlane.xlu1 %348  ;;  %v343_v12 = vpop.xlane.xlu0 %342 }
  0xa0   : > { %v1415_v13 = vmul.f32 -1.442695, %v349_v0  ;;  %v1413_v14 = vmul.f32 -1.442695, %v343_v12  ;;  %v2194_v0 = vld [vmem:[%s2134_s24 + $0x98] sm:$0xff]  ;;  %v2197_v12 = vld [vmem:[%s2134_s24 + $0x80] sm:$0xff] }
  0xa2   : > { %1491 = vpow2.f32 %v1415_v13  ;;  %v2200_v13 = vld [vmem:[%s2134_s24 + $0x88] sm:$0xff] }
  0xa3   : > { %1493 = vpow2.f32 %v1413_v14  ;;  %v352_v19 = vpop.xlane.xlu1 %351  ;;  %v346_v20 = vpop.xlane.xlu0 %345  ;;  %v2203_v14 = vld [vmem:[%s2134_s24 + $0xb0] sm:$0xff] }
  0xa4   : > { %v1416_v21 = vmul.f32 -1.442695, %v352_v19  ;;  %v1414_v24 = vmul.f32 -1.442695, %v346_v20  ;;  %v2206_v19 = vld [vmem:[%s2134_s24 + $0xb8] sm:$0xff]  ;;  %v2209_v20 = vld [vmem:[%s2134_s24 + $0xa0] sm:$0xff] }
  0xa6   : > { %1495 = vpow2.f32 %v1416_v21  ;;  %v2212_v21 = vld [vmem:[%s2134_s24 + $0xa8] sm:$0xff] }
  0xa7   : > { %1497 = vpow2.f32 %v1414_v24  ;;  %v358_v29 = vpop.xlane.xlu1 %357  ;;  %v355_v36 = vpop.xlane.xlu0 %354  ;;  %v2215_v24 = vld [vmem:[%s2134_s24 + $0xd0] sm:$0xff] }
  0xa8   : > { %v1418_v37 = vmul.f32 -1.442695, %v358_v29  ;;  %v1417_v38 = vmul.f32 -1.442695, %v355_v36  ;;  %v2218_v29 = vld [vmem:[%s2134_s24 + $0xd8] sm:$0xff]  ;;  %v2221_v36 = vld [vmem:[%s2134_s24 + $0xc0] sm:$0xff] }
  0xaa   : > { %1499 = vpow2.f32 %v1418_v37  ;;  %v2224_v37 = vld [vmem:[%s2134_s24 + $0xc8] sm:$0xff] }
  0xab   : > { %1501 = vpow2.f32 %v1417_v38  ;;  %v364_v43 = vpop.xlane.xlu1 %363  ;;  %v361_v44 = vpop.xlane.xlu0 %360  ;;  %v2227_v38 = vld [vmem:[%s2134_s24 + $0xf0] sm:$0xff] }
  0xac   : > { %v1420_v45 = vmul.f32 -1.442695, %v364_v43  ;;  %v1419_v49 = vmul.f32 -1.442695, %v361_v44  ;;  %v2230_v43 = vld [vmem:[%s2134_s24 + $0xf8] sm:$0xff]  ;;  %v2233_v44 = vld [vmem:[%s2134_s24 + $0xe0] sm:$0xff] }
  0xae   : > { %1503 = vpow2.f32 %v1420_v45  ;;  %v2236_v45 = vld [vmem:[%s2134_s24 + $0xe8] sm:$0xff] }
  0xaf   : > { %v1492_v55 = vpop.eup %1491  ;;  %1505 = vpow2.f32 %v1419_v49  ;;  %v370_v4 = vpop.xlane.xlu1 %369 }
  0xb0   : > { %v367_v6 = vpop.xlane.xlu0 %366  ;;  %v1494_v7 = vpop.eup %1493  ;;  %v739_v15 = vadd.f32 1.0, %v1492_v55  ;;  %v1422_v16 = vmul.f32 -1.442695, %v370_v4  ;;  %v2241_v55 = vld [vmem:[%s2134_s24 + $0x110] sm:$0xff]  ;;  %v2244_v4 = vld [vmem:[%s2134_s24 + $0x118] sm:$0xff] }
  0xb1   : > { %v737_v17 = vadd.f32 1.0, %v1494_v7  ;;  %v1421_v23 = vmul.f32 -1.442695, %v367_v6  ;;  %v2247_v6 = vld [vmem:[%s2134_s24 + $0x100] sm:$0xff]  ;;  %v2250_v7 = vld [vmem:[%s2134_s24 + $0x108] sm:$0xff] }
  0xb2   : > { %1507 = vrcp.f32 %v739_v15  ;;  %v2253_v15 = vld [vmem:[%s2134_s24 + $0x130] sm:$0xff] }
  0xb3   : > { %v1496_v27 = vpop.eup %1495  ;;  %1509 = vrcp.f32 %v737_v17  ;;  %v376_v34 = vpop.xlane.xlu1 %375  ;;  %v2259_v17 = vld [vmem:[%s2134_s24 + $0x120] sm:$0xff] }
  0xb4   : > { %v373_v35 = vpop.xlane.xlu0 %372  ;;  %v1498_v39 = vpop.eup %1497  ;;  %v740_v41 = vadd.f32 1.0, %v1496_v27  ;;  %1511 = vpow2.f32 %v1422_v16  ;;  %v1424_v42 = vmul.f32 -1.442695, %v376_v34  ;;  %v2256_v16 = vld [vmem:[%s2134_s24 + $0x138] sm:$0xff]  ;;  %v2265_v27 = vld [vmem:[%s2134_s24 + $0x150] sm:$0xff] }
  0xb5   : > { %v738_v46 = vadd.f32 1.0, %v1498_v39  ;;  %1513 = vpow2.f32 %v1421_v23  ;;  %v1423_v58 = vmul.f32 -1.442695, %v373_v35  ;;  %v2262_v23 = vld [vmem:[%s2134_s24 + $0x128] sm:$0xff]  ;;  %v2268_v34 = vld [vmem:[%s2134_s24 + $0x158] sm:$0xff]  ;;  %v2271_v35 = vld [vmem:[%s2134_s24 + $0x140] sm:$0xff] }
  0xb6   : > { %1515 = vrcp.f32 %v740_v41  ;;  %v2274_v39 = vld [vmem:[%s2134_s24 + $0x148] sm:$0xff]  ;;  %v2277_v41 = vld [vmem:[%s2134_s24 + $0x170] sm:$0xff] }
  0xb7   : > { %v1500_v56 = vpop.eup %1499  ;;  %1517 = vrcp.f32 %v738_v46  ;;  %v382_v57 = vpop.xlane.xlu1 %381  ;;  %v2283_v46 = vld [vmem:[%s2134_s24 + $0x160] sm:$0xff] }
  0xb8   : > { %v379_v62 = vpop.xlane.xlu0 %378  ;;  %v1502_v5 = vpop.eup %1501  ;;  %v742_v11 = vadd.f32 1.0, %v1500_v56  ;;  %1519 = vpow2.f32 %v1424_v42  ;;  %v1426_v61 = vmul.f32 -1.442695, %v382_v57  ;;  %v2280_v42 = vld [vmem:[%s2134_s24 + $0x178] sm:$0xff]  ;;  %v2289_v56 = vld [vmem:[%s2134_s24 + $0x190] sm:$0xff] }
  0xb9   : > { %v741_v18 = vadd.f32 1.0, %v1502_v5  ;;  %1521 = vpow2.f32 %v1423_v58  ;;  %v1425_v63 = vmul.f32 -1.442695, %v379_v62  ;;  %v2286_v58 = vld [vmem:[%s2134_s24 + $0x168] sm:$0xff]  ;;  %v2292_v57 = vld [vmem:[%s2134_s24 + $0x198] sm:$0xff]  ;;  %v2295_v62 = vld [vmem:[%s2134_s24 + $0x180] sm:$0xff] }
  0xba   : > { %1523 = vrcp.f32 %v742_v11  ;;  %2888 = vst [vmem:[#allocation2_spill] sm:$0xff] %v2292_v57  ;;  %2889 = vst [vmem:[#allocation3_spill] sm:$0xff] %v2295_v62  ;;  %v2298_v5 = vld [vmem:[%s2134_s24 + $0x188] sm:$0xff]  ;;  %v2301_v11 = vld [vmem:[%s2134_s24 + $0x1b0] sm:$0xff] }
  0xbb   : > { %v1504_v22 = vpop.eup %1503  ;;  %1525 = vrcp.f32 %v741_v18  ;;  %v388_v54 = vpop.xlane.xlu1 %387  ;;  %2890 = vst [vmem:[#allocation4_spill] sm:$0xff] %v2298_v5  ;;  %2891 = vst [vmem:[#allocation5_spill] sm:$0xff] %v2301_v11  ;;  %v2307_v18 = vld [vmem:[%s2134_s24 + $0x1a0] sm:$0xff]  ;;  %v2478_v11 = vld [vmem:[%s2134_s24 + $0x368] sm:$0xff] }
  0xbc   : > { %v385_v25 = vpop.xlane.xlu0 %384  ;;  %v1506_v26 = vpop.eup %1505  ;;  %v2148_v32 = vadd.f32 1.0, %v1504_v22  ;;  %1527 = vpow2.f32 %v1426_v61  ;;  %v2150_v33 = vmul.f32 -1.442695, %v388_v54  ;;  %v2304_v61 = vld [vmem:[%s2134_s24 + $0x1b8] sm:$0xff]  ;;  %2893 = vst [vmem:[#allocation7_spill] sm:$0xff] %v2307_v18  ;;  %v2313_v22 = vld [vmem:[%s2134_s24 + $0x1d0] sm:$0xff] }
  0xbd   : > { %v2188_v9 = vadd.f32 1.0, %v1506_v26  ;;  %1529 = vpow2.f32 %v1425_v63  ;;  %v2238_v49 = vmul.f32 -1.442695, %v385_v25  ;;  %2892 = vst [vmem:[#allocation6_spill] sm:$0xff] %v2304_v61  ;;  %v2310_v63 = vld [vmem:[%s2134_s24 + $0x1a8] sm:$0xff]  ;;  %2895 = vst [vmem:[#allocation9_spill] sm:$0xff] %v2313_v22 }
  0xbe   : > { %2894 = vst [vmem:[#allocation8_spill] sm:$0xff] %v2310_v63  ;;  %v2316_v54 = vld [vmem:[%s2134_s24 + $0x1d8] sm:$0xff]  ;;  %v2319_v25 = vld [vmem:[%s2134_s24 + $0x1c0] sm:$0xff]  ;;  %v2322_v26 = vld [vmem:[%s2134_s24 + $0x1c8] sm:$0xff]  ;;  %1531 = vrcp.f32 %v2148_v32 }
  0xbf   : > { %2896 = vst [vmem:[#allocation10_spill] sm:$0xff] %v2316_v54  ;;  %2897 = vst [vmem:[#allocation11_spill] sm:$0xff] %v2319_v25  ;;  %v2325_v61 = vld [vmem:[%s2134_s24 + $0x1f0] sm:$0xff]  ;;  %v2328_v18 = vld [vmem:[%s2134_s24 + $0x1f8] sm:$0xff]  ;;  %1533 = vrcp.f32 %v2188_v9 }
  0xc0   : > { %2898 = vst [vmem:[#allocation12_spill] sm:$0xff] %v2322_v26  ;;  %2899 = vst [vmem:[#allocation13_spill] sm:$0xff] %v2325_v61  ;;  %v2331_v63 = vld [vmem:[%s2134_s24 + $0x1e0] sm:$0xff]  ;;  %v2334_v22 = vld [vmem:[%s2134_s24 + $0x1e8] sm:$0xff]  ;;  %1535 = vpow2.f32 %v2150_v33 }
  0xc1   : > { %2900 = vst [vmem:[#allocation14_spill] sm:$0xff] %v2328_v18  ;;  %2901 = vst [vmem:[#allocation15_spill] sm:$0xff] %v2331_v63  ;;  %v2337_v54 = vld [vmem:[%s2134_s24 + $0x210] sm:$0xff]  ;;  %v2340_v25 = vld [vmem:[%s2134_s24 + $0x218] sm:$0xff]  ;;  %1537 = vpow2.f32 %v2238_v49 }
  0xc2   : > { %2902 = vst [vmem:[#allocation16_spill] sm:$0xff] %v2334_v22  ;;  %2903 = vst [vmem:[#allocation17_spill] sm:$0xff] %v2337_v54  ;;  %v2343_v26 = vld [vmem:[%s2134_s24 + $0x200] sm:$0xff]  ;;  %v2346_v61 = vld [vmem:[%s2134_s24 + $0x208] sm:$0xff] }
  0xc3   : > { %2904 = vst [vmem:[#allocation18_spill] sm:$0xff] %v2340_v25  ;;  %2905 = vst [vmem:[#allocation19_spill] sm:$0xff] %v2343_v26  ;;  %v2349_v18 = vld [vmem:[%s2134_s24 + $0x230] sm:$0xff]  ;;  %v2352_v63 = vld [vmem:[%s2134_s24 + $0x238] sm:$0xff] }
  0xc4   : > { %2906 = vst [vmem:[#allocation20_spill] sm:$0xff] %v2346_v61  ;;  %2907 = vst [vmem:[#allocation21_spill] sm:$0xff] %v2349_v18  ;;  %v2355_v22 = vld [vmem:[%s2134_s24 + $0x220] sm:$0xff]  ;;  %v2358_v54 = vld [vmem:[%s2134_s24 + $0x228] sm:$0xff] }
  0xc5   : > { %2908 = vst [vmem:[#allocation22_spill] sm:$0xff] %v2352_v63  ;;  %2909 = vst [vmem:[#allocation23_spill] sm:$0xff] %v2355_v22  ;;  %v2361_v25 = vld [vmem:[%s2134_s24 + $0x250] sm:$0xff]  ;;  %v2364_v26 = vld [vmem:[%s2134_s24 + $0x258] sm:$0xff] }
  0xc6   : > { %2910 = vst [vmem:[#allocation24_spill] sm:$0xff] %v2358_v54  ;;  %2911 = vst [vmem:[#allocation25_spill] sm:$0xff] %v2361_v25  ;;  %v2367_v61 = vld [vmem:[%s2134_s24 + $0x240] sm:$0xff]  ;;  %v2370_v18 = vld [vmem:[%s2134_s24 + $0x248] sm:$0xff] }
  0xc7   : > { %2912 = vst [vmem:[#allocation26_spill] sm:$0xff] %v2364_v26  ;;  %2913 = vst [vmem:[#allocation27_spill] sm:$0xff] %v2367_v61  ;;  %v2373_v63 = vld [vmem:[%s2134_s24 + $0x270] sm:$0xff]  ;;  %v2376_v22 = vld [vmem:[%s2134_s24 + $0x278] sm:$0xff] }
  0xc8   : > { %2914 = vst [vmem:[#allocation28_spill] sm:$0xff] %v2370_v18  ;;  %2915 = vst [vmem:[#allocation29_spill] sm:$0xff] %v2373_v63  ;;  %v2379_v54 = vld [vmem:[%s2134_s24 + $0x260] sm:$0xff]  ;;  %v2382_v25 = vld [vmem:[%s2134_s24 + $0x268] sm:$0xff] }
  0xc9   : > { %2916 = vst [vmem:[#allocation30_spill] sm:$0xff] %v2376_v22  ;;  %2917 = vst [vmem:[#allocation31_spill] sm:$0xff] %v2379_v54  ;;  %v2385_v26 = vld [vmem:[%s2134_s24 + $0x290] sm:$0xff]  ;;  %v2388_v61 = vld [vmem:[%s2134_s24 + $0x298] sm:$0xff] }
  0xca   : > { %2918 = vst [vmem:[#allocation32_spill] sm:$0xff] %v2382_v25  ;;  %2919 = vst [vmem:[#allocation33_spill] sm:$0xff] %v2385_v26  ;;  %v2391_v18 = vld [vmem:[%s2134_s24 + $0x280] sm:$0xff]  ;;  %v2394_v63 = vld [vmem:[%s2134_s24 + $0x288] sm:$0xff] }
  0xcb   : > { %2920 = vst [vmem:[#allocation34_spill] sm:$0xff] %v2388_v61  ;;  %2921 = vst [vmem:[#allocation35_spill] sm:$0xff] %v2391_v18  ;;  %v2397_v22 = vld [vmem:[%s2134_s24 + $0x2b0] sm:$0xff]  ;;  %v2400_v54 = vld [vmem:[%s2134_s24 + $0x2b8] sm:$0xff] }
  0xcc   : > { %2922 = vst [vmem:[#allocation36_spill] sm:$0xff] %v2394_v63  ;;  %2923 = vst [vmem:[#allocation37_spill] sm:$0xff] %v2397_v22  ;;  %v2403_v25 = vld [vmem:[%s2134_s24 + $0x2a0] sm:$0xff]  ;;  %v2406_v26 = vld [vmem:[%s2134_s24 + $0x2a8] sm:$0xff] }
  0xcd   : > { %2924 = vst [vmem:[#allocation38_spill] sm:$0xff] %v2400_v54  ;;  %2925 = vst [vmem:[#allocation39_spill] sm:$0xff] %v2403_v25  ;;  %v2409_v61 = vld [vmem:[%s2134_s24 + $0x2d0] sm:$0xff]  ;;  %v2412_v18 = vld [vmem:[%s2134_s24 + $0x2d8] sm:$0xff] }
  0xce   : > { %2926 = vst [vmem:[#allocation40_spill] sm:$0xff] %v2406_v26  ;;  %2927 = vst [vmem:[#allocation41_spill] sm:$0xff] %v2409_v61  ;;  %v2415_v63 = vld [vmem:[%s2134_s24 + $0x2c0] sm:$0xff]  ;;  %v2418_v22 = vld [vmem:[%s2134_s24 + $0x2c8] sm:$0xff] }
  0xcf   : > { %2928 = vst [vmem:[#allocation42_spill] sm:$0xff] %v2412_v18  ;;  %2929 = vst [vmem:[#allocation43_spill] sm:$0xff] %v2415_v63  ;;  %v2421_v54 = vld [vmem:[%s2134_s24 + $0x2f0] sm:$0xff]  ;;  %v2424_v25 = vld [vmem:[%s2134_s24 + $0x2f8] sm:$0xff] }
  0xd0   : > { %2930 = vst [vmem:[#allocation44_spill] sm:$0xff] %v2418_v22  ;;  %2931 = vst [vmem:[#allocation45_spill] sm:$0xff] %v2421_v54  ;;  %v2427_v26 = vld [vmem:[%s2134_s24 + $0x2e0] sm:$0xff]  ;;  %v2430_v61 = vld [vmem:[%s2134_s24 + $0x2e8] sm:$0xff] }
  0xd1   : > { %2932 = vst [vmem:[#allocation46_spill] sm:$0xff] %v2424_v25  ;;  %2933 = vst [vmem:[#allocation47_spill] sm:$0xff] %v2427_v26  ;;  %v2433_v18 = vld [vmem:[%s2134_s24 + $0x310] sm:$0xff]  ;;  %v2436_v63 = vld [vmem:[%s2134_s24 + $0x318] sm:$0xff] }
  0xd2   : > { %2934 = vst [vmem:[#allocation48_spill] sm:$0xff] %v2430_v61  ;;  %2935 = vst [vmem:[#allocation49_spill] sm:$0xff] %v2433_v18  ;;  %v2439_v22 = vld [vmem:[%s2134_s24 + $0x300] sm:$0xff]  ;;  %v2442_v54 = vld [vmem:[%s2134_s24 + $0x308] sm:$0xff] }
  0xd3   : > { %2936 = vst [vmem:[#allocation50_spill] sm:$0xff] %v2436_v63  ;;  %2937 = vst [vmem:[#allocation51_spill] sm:$0xff] %v2439_v22  ;;  %v2445_v25 = vld [vmem:[%s2134_s24 + $0x330] sm:$0xff]  ;;  %v2448_v26 = vld [vmem:[%s2134_s24 + $0x338] sm:$0xff] }
  0xd4   : > { %2938 = vst [vmem:[#allocation52_spill] sm:$0xff] %v2442_v54  ;;  %2939 = vst [vmem:[#allocation53_spill] sm:$0xff] %v2445_v25  ;;  %v2451_v61 = vld [vmem:[%s2134_s24 + $0x320] sm:$0xff]  ;;  %v2454_v18 = vld [vmem:[%s2134_s24 + $0x328] sm:$0xff] }
  0xd5   : > { %2940 = vst [vmem:[#allocation54_spill] sm:$0xff] %v2448_v26  ;;  %2941 = vst [vmem:[#allocation55_spill] sm:$0xff] %v2451_v61  ;;  %v2457_v63 = vld [vmem:[%s2134_s24 + $0x350] sm:$0xff]  ;;  %v2460_v22 = vld [vmem:[%s2134_s24 + $0x358] sm:$0xff] }
  0xd6   : > { %2942 = vst [vmem:[#allocation56_spill] sm:$0xff] %v2454_v18  ;;  %2943 = vst [vmem:[#allocation57_spill] sm:$0xff] %v2457_v63  ;;  %v2463_v54 = vld [vmem:[%s2134_s24 + $0x340] sm:$0xff]  ;;  %v2466_v25 = vld [vmem:[%s2134_s24 + $0x348] sm:$0xff] }
  0xd7   : > { %2944 = vst [vmem:[#allocation58_spill] sm:$0xff] %v2460_v22  ;;  %2945 = vst [vmem:[#allocation59_spill] sm:$0xff] %v2463_v54  ;;  %v2469_v26 = vld [vmem:[%s2134_s24 + $0x370] sm:$0xff]  ;;  %v2472_v61 = vld [vmem:[%s2134_s24 + $0x378] sm:$0xff] }
  0xd8   : > { %2946 = vst [vmem:[#allocation60_spill] sm:$0xff] %v2466_v25  ;;  %2947 = vst [vmem:[#allocation61_spill] sm:$0xff] %v2469_v26  ;;  %v2475_v18 = vld [vmem:[%s2134_s24 + $0x360] sm:$0xff]  ;;  %v2481_v63 = vld [vmem:[%s2134_s24 + $0x390] sm:$0xff] }
  0xd9   : > { %2948 = vst [vmem:[#allocation62_spill] sm:$0xff] %v2472_v61  ;;  %2949 = vst [vmem:[#allocation63_spill] sm:$0xff] %v2475_v18  ;;  %v2484_v22 = vld [vmem:[%s2134_s24 + $0x398] sm:$0xff]  ;;  %v2487_v54 = vld [vmem:[%s2134_s24 + $0x380] sm:$0xff] }
  0xda   : > { %2950 = vst [vmem:[#allocation64_spill] sm:$0xff] %v2478_v11  ;;  %2951 = vst [vmem:[#allocation65_spill] sm:$0xff] %v2481_v63  ;;  %v2490_v25 = vld [vmem:[%s2134_s24 + $0x388] sm:$0xff]  ;;  %v2493_v26 = vld [vmem:[%s2134_s24 + $0x3b0] sm:$0xff] }
  0xdb   : > { %2952 = vst [vmem:[#allocation66_spill] sm:$0xff] %v2484_v22  ;;  %2953 = vst [vmem:[#allocation67_spill] sm:$0xff] %v2487_v54  ;;  %v2496_v61 = vld [vmem:[%s2134_s24 + $0x3b8] sm:$0xff]  ;;  %v2499_v5 = vld [vmem:[%s2134_s24 + $0x3a0] sm:$0xff] }
  0xdc   : > { %2954 = vst [vmem:[#allocation68_spill] sm:$0xff] %v2490_v25  ;;  %2955 = vst [vmem:[#allocation69_spill] sm:$0xff] %v2493_v26  ;;  %v2502_v18 = vld [vmem:[%s2134_s24 + $0x3a8] sm:$0xff]  ;;  %v2505_v11 = vld [vmem:[%s2134_s24 + $0x3d0] sm:$0xff] }
  0xdd   : > { %2956 = vst [vmem:[#allocation70_spill] sm:$0xff] %v2496_v61  ;;  %2957 = vst [vmem:[#allocation71_spill] sm:$0xff] %v2499_v5  ;;  %v2508_v63 = vld [vmem:[%s2134_s24 + $0x3d8] sm:$0xff]  ;;  %v2511_v22 = vld [vmem:[%s2134_s24 + $0x3c0] sm:$0xff] }
  0xde   : > { %2958 = vst [vmem:[#allocation72_spill] sm:$0xff] %v2502_v18  ;;  %2959 = vst [vmem:[#allocation73_spill] sm:$0xff] %v2505_v11  ;;  %v2514_v54 = vld [vmem:[%s2134_s24 + $0x3c8] sm:$0xff]  ;;  %v2517_v25 = vld [vmem:[%s2134_s24 + $0x3f0] sm:$0xff]  ;;  %v1508_v11 = vpop.eup %1507 }
  0xdf   : > { %2960 = vst [vmem:[#allocation74_spill] sm:$0xff] %v2508_v63  ;;  %2961 = vst [vmem:[#allocation75_spill] sm:$0xff] %v2511_v22  ;;  %v2520_v26 = vld [vmem:[%s2134_s24 + $0x3f8] sm:$0xff]  ;;  %v2524_v5 = vld [vmem:[%s2134_s24 + $0x3e0] sm:$0xff]  ;;  %v1072_v22 = vmul.f32 %v1508_v11, %v2140_v28 }
  0xe0   : > { %2962 = vst [vmem:[#allocation76_spill] sm:$0xff] %v2514_v54  ;;  %2963 = vst [vmem:[#allocation77_spill] sm:$0xff] %v2517_v25  ;;  %v2527_v18 = vld [vmem:[%s2134_s24 + $0x3e8] sm:$0xff]  ;;  %v2530_v61 = vld [vmem:[%s2134_s24 + $0x410] sm:$0xff]  ;;  %v394_v25 = vpop.xlane.xlu1 %393  ;;  %v391_v54 = vpop.xlane.xlu0 %390 }
  0xe1   : > { %2964 = vst [vmem:[#allocation78_spill] sm:$0xff] %v2520_v26  ;;  %2965 = vst [vmem:[#allocation79_spill] sm:$0xff] %v2524_v5  ;;  %v2541_v26 = vld [vmem:[%s2134_s24 + $0x418] sm:$0xff]  ;;  %v2544_v32 = vld [vmem:[%s2134_s24 + $0x400] sm:$0xff]  ;;  %v1430_v63 = vmul.f32 -1.442695, %v394_v25 }
  0xe2   : > { %2966 = vst [vmem:[#allocation80_spill] sm:$0xff] %v2527_v18  ;;  %2967 = vst [vmem:[#allocation81_spill] sm:$0xff] %v2530_v61  ;;  %v2547_v5 = vld [vmem:[%s2134_s24 + $0x408] sm:$0xff]  ;;  %v1510_v61 = vpop.eup %1509  ;;  %v1071_v18 = vmul.f32 %v1508_v11, %v2137_v53 }
  0xe3   : > { %2968 = vst [vmem:[#allocation82_spill] sm:$0xff] %v2541_v26  ;;  %2969 = vst [vmem:[#allocation83_spill] sm:$0xff] %v2544_v32  ;;  %v1512_v9 = vpop.eup %1511  ;;  %v1067_v26 = vmul.f32 %v1510_v61, %v2143_v30  ;;  %v1068_v32 = vmul.f32 %v1510_v61, %v2146_v31  ;;  %1539 = vpow2.f32 %v1430_v63 }
  0xe4   : > { %2970 = vst [vmem:[#allocation84_spill] sm:$0xff] %v2547_v5  ;;  %v1429_v5 = vmul.f32 -1.442695, %v391_v54  ;;  %v1514_v62 = vpop.eup %1513  ;;  %v746_v57 = vadd.f32 1.0, %v1512_v9  ;;  %1204 = vst [vmem:[%s2537_s27 + $0x20] sm:$0xff] %v1071_v18  ;;  %v400_v33 = vpop.xlane.xlu1 %399 }
  0xe5   : > { %1205 = vst.msk [vmem:[%s2537_s27 + $0x28] sm:$0xff] %vm1200_vm1, %v1072_v22  ;;  %v1516_v53 = vpop.eup %1515  ;;  %v745_v28 = vadd.f32 1.0, %v1514_v62  ;;  %v397_v11 = vpop.xlane.xlu0 %396  ;;  %1199 = vst [vmem:[%s2537_s27] sm:$0xff] %v1067_v26  ;;  %v1432_v61 = vmul.f32 -1.442695, %v400_v33 }
  0xe6   : > { %1541 = vpow2.f32 %v1429_v5  ;;  %1201 = vst.msk [vmem:[%s2537_s27 + $0x8] sm:$0xff] %vm1200_vm1, %v1068_v32  ;;  %v1518_v30 = vpop.eup %1517  ;;  %v1073_v31 = vmul.f32 %v1516_v53, %v2153_v40  ;;  %v1074_v49 = vmul.f32 %v1516_v53, %v2156_v48  ;;  %v1431_v63 = vmul.f32 -1.442695, %v397_v11 }
  0xe7   : > { %1543 = vrcp.f32 %v746_v57  ;;  %v1520_v18 = vpop.eup %1519  ;;  %v1069_v62 = vmul.f32 %v1518_v30, %v2159_v47  ;;  %v1070_v5 = vmul.f32 %v1518_v30, %v2162_v59 }
  0xe8   : > { %1545 = vrcp.f32 %v745_v28  ;;  %v1522_v22 = vpop.eup %1521  ;;  %v748_v54 = vadd.f32 1.0, %v1520_v18  ;;  %1206 = vst [vmem:[%s2537_s27 + $0x30] sm:$0xff] %v1073_v31  ;;  %1207 = vst.msk [vmem:[%s2537_s27 + $0x38] sm:$0xff] %vm1200_vm1, %v1074_v49  ;;  %v406_v48 = vpop.xlane.xlu1 %405 }
  0xe9   : > { %1547 = vpow2.f32 %v1432_v61  ;;  %v1524_v40 = vpop.eup %1523  ;;  %v747_v25 = vadd.f32 1.0, %v1522_v22  ;;  %v403_v57 = vpop.xlane.xlu0 %402  ;;  %1202 = vst [vmem:[%s2537_s27 + $0x10] sm:$0xff] %v1069_v62  ;;  %1203 = vst.msk [vmem:[%s2537_s27 + $0x18] sm:$0xff] %vm1200_vm1, %v1070_v5  ;;  %v1434_v32 = vmul.f32 -1.442695, %v406_v48 }
  0xea   : > { %1549 = vpow2.f32 %v1431_v63  ;;  %v1526_v47 = vpop.eup %1525  ;;  %v1077_v59 = vmul.f32 %v1524_v40, %v2165_v50  ;;  %v1078_v26 = vmul.f32 %v1524_v40, %v2168_v51  ;;  %v1433_v33 = vmul.f32 -1.442695, %v403_v57 }
  0xeb   : > { %1551 = vrcp.f32 %v748_v54  ;;  %v1528_v9 = vpop.eup %1527  ;;  %v1075_v53 = vmul.f32 %v1526_v47, %v2171_v52  ;;  %v1076_v28 = vmul.f32 %v1526_v47, %v2174_v60 }
  0xec   : > { %1553 = vrcp.f32 %v747_v25  ;;  %v1530_v11 = vpop.eup %1529  ;;  %v750_v30 = vadd.f32 1.0, %v1528_v9  ;;  %1210 = vst [vmem:[%s2537_s27 + $0x50] sm:$0xff] %v1077_v59  ;;  %1211 = vst.msk [vmem:[%s2537_s27 + $0x58] sm:$0xff] %vm1200_vm1, %v1078_v26  ;;  %v412_v51 = vpop.xlane.xlu1 %411 }
  0xed   : > { %1555 = vpow2.f32 %v1434_v32  ;;  %v1532_v50 = vpop.eup %1531  ;;  %v749_v31 = vadd.f32 1.0, %v1530_v11  ;;  %v409_v49 = vpop.xlane.xlu0 %408  ;;  %1208 = vst [vmem:[%s2537_s27 + $0x40] sm:$0xff] %v1075_v53  ;;  %1209 = vst.msk [vmem:[%s2537_s27 + $0x48] sm:$0xff] %vm1200_vm1, %v1076_v28  ;;  %v1436_v18 = vmul.f32 -1.442695, %v412_v51 }
  0xee   : > { %1557 = vpow2.f32 %v1433_v33  ;;  %v1534_v52 = vpop.eup %1533  ;;  %v1081_v60 = vmul.f32 %v1532_v50, %v2177_v1  ;;  %v1082_v61 = vmul.f32 %v1532_v50, %v2180_v2  ;;  %v1435_v22 = vmul.f32 -1.442695, %v409_v49 }
  0xef   : > { %1559 = vrcp.f32 %v750_v30  ;;  %v1536_v62 = vpop.eup %1535  ;;  %v1079_v5 = vmul.f32 %v1534_v52, %v2183_v3  ;;  %v1080_v63 = vmul.f32 %v1534_v52, %v2186_v8 }
  0xf0   : > { %1561 = vrcp.f32 %v749_v31  ;;  %v1538_v54 = vpop.eup %1537  ;;  %v752_v40 = vadd.f32 1.0, %v1536_v62  ;;  %1214 = vst [vmem:[%s2537_s27 + $0x70] sm:$0xff] %v1081_v60  ;;  %1215 = vst.msk [vmem:[%s2537_s27 + $0x78] sm:$0xff] %vm1200_vm1, %v1082_v61  ;;  %v418_v2 = vpop.xlane.xlu1 %417 }
  0xf1   : > { %1563 = vpow2.f32 %v1436_v18  ;;  %v1540_v1 = vpop.eup %1539  ;;  %v751_v25 = vadd.f32 1.0, %v1538_v54  ;;  %v415_v48 = vpop.xlane.xlu0 %414  ;;  %1212 = vst [vmem:[%s2537_s27 + $0x60] sm:$0xff] %v1079_v5  ;;  %1213 = vst.msk [vmem:[%s2537_s27 + $0x68] sm:$0xff] %vm1200_vm1, %v1080_v63  ;;  %v1438_v8 = vmul.f32 -1.442695, %v418_v2 }
  0xf2   : > { %1565 = vpow2.f32 %v1435_v22  ;;  %v754_v3 = vadd.f32 1.0, %v1540_v1  ;;  %v1437_v26 = vmul.f32 -1.442695, %v415_v48 }
  0xf3   : > { %v1542_v57 = vpop.eup %1541  ;;  %1567 = vrcp.f32 %v752_v40 }
  0xf4   : > { %v1544_v47 = vpop.eup %1543  ;;  %1569 = vrcp.f32 %v751_v25  ;;  %v753_v59 = vadd.f32 1.0, %v1542_v57  ;;  %v424_v30 = vpop.xlane.xlu1 %423 }
  0xf5   : > { %v1546_v32 = vpop.eup %1545  ;;  %v1085_v9 = vmul.f32 %v1544_v47, %v2191_v10  ;;  %v1086_v53 = vmul.f32 %v1544_v47, %v2194_v0  ;;  %1571 = vrcp.f32 %v754_v3  ;;  %v421_v50 = vpop.xlane.xlu0 %420  ;;  %v1440_v49 = vmul.f32 -1.442695, %v424_v30 }
  0xf6   : > { %v1548_v28 = vpop.eup %1547  ;;  %v1083_v33 = vmul.f32 %v1546_v32, %v2197_v12  ;;  %v1084_v11 = vmul.f32 %v1546_v32, %v2200_v13  ;;  %1573 = vrcp.f32 %v753_v59  ;;  %v1439_v52 = vmul.f32 -1.442695, %v421_v50 }
  0xf7   : > { %v1550_v31 = vpop.eup %1549  ;;  %v756_v51 = vadd.f32 1.0, %v1548_v28  ;;  %1575 = vpow2.f32 %v1438_v8  ;;  %1218 = vst [vmem:[%s2537_s27 + $0x90] sm:$0xff] %v1085_v9  ;;  %1219 = vst.msk [vmem:[%s2537_s27 + $0x98] sm:$0xff] %vm1200_vm1, %v1086_v53 }
  0xf8   : > { %v1552_v10 = vpop.eup %1551  ;;  %v755_v0 = vadd.f32 1.0, %v1550_v31  ;;  %1577 = vpow2.f32 %v1437_v26  ;;  %1216 = vst [vmem:[%s2537_s27 + $0x80] sm:$0xff] %v1083_v33  ;;  %1217 = vst.msk [vmem:[%s2537_s27 + $0x88] sm:$0xff] %vm1200_vm1, %v1084_v11  ;;  %v430_v5 = vpop.xlane.xlu1 %429 }
  0xf9   : > { %v1554_v12 = vpop.eup %1553  ;;  %v1089_v13 = vmul.f32 %v1552_v10, %v2203_v14  ;;  %v1090_v60 = vmul.f32 %v1552_v10, %v2206_v19  ;;  %1579 = vrcp.f32 %v756_v51  ;;  %v427_v63 = vpop.xlane.xlu0 %426  ;;  %v1442_v40 = vmul.f32 -1.442695, %v430_v5 }
  0xfa   : > { %v1556_v61 = vpop.eup %1555  ;;  %v1087_v18 = vmul.f32 %v1554_v12, %v2209_v20  ;;  %v1088_v62 = vmul.f32 %v1554_v12, %v2212_v21  ;;  %1581 = vrcp.f32 %v755_v0  ;;  %v1441_v1 = vmul.f32 -1.442695, %v427_v63 }
  0xfb   : > { %v1558_v22 = vpop.eup %1557  ;;  %v758_v54 = vadd.f32 1.0, %v1556_v61  ;;  %1583 = vpow2.f32 %v1440_v49  ;;  %1222 = vst [vmem:[%s2537_s27 + $0xb0] sm:$0xff] %v1089_v13  ;;  %1223 = vst.msk [vmem:[%s2537_s27 + $0xb8] sm:$0xff] %vm1200_vm1, %v1090_v60 }
  0xfc   : > { %v1560_v14 = vpop.eup %1559  ;;  %v757_v19 = vadd.f32 1.0, %v1558_v22  ;;  %1585 = vpow2.f32 %v1439_v52  ;;  %1220 = vst [vmem:[%s2537_s27 + $0xa0] sm:$0xff] %v1087_v18  ;;  %1221 = vst.msk [vmem:[%s2537_s27 + $0xa8] sm:$0xff] %vm1200_vm1, %v1088_v62  ;;  %v436_v3 = vpop.xlane.xlu1 %435 }
  0xfd   : > { %v1562_v20 = vpop.eup %1561  ;;  %v1093_v21 = vmul.f32 %v1560_v14, %v2215_v24  ;;  %v1094_v25 = vmul.f32 %v1560_v14, %v2218_v29  ;;  %1587 = vrcp.f32 %v758_v54  ;;  %v433_v8 = vpop.xlane.xlu0 %432  ;;  %v1444_v26 = vmul.f32 -1.442695, %v436_v3 }
  0xfe   : > { %v1564_v2 = vpop.eup %1563  ;;  %v1091_v48 = vmul.f32 %v1562_v20, %v2221_v36  ;;  %v1092_v57 = vmul.f32 %v1562_v20, %v2224_v37  ;;  %1589 = vrcp.f32 %v757_v19  ;;  %v1443_v32 = vmul.f32 -1.442695, %v433_v8 }
  0xff   : > { %v1566_v47 = vpop.eup %1565  ;;  %v760_v59 = vadd.f32 1.0, %v1564_v2  ;;  %1591 = vpow2.f32 %v1442_v40  ;;  %1226 = vst [vmem:[%s2537_s27 + $0xd0] sm:$0xff] %v1093_v21  ;;  %1227 = vst.msk [vmem:[%s2537_s27 + $0xd8] sm:$0xff] %vm1200_vm1, %v1094_v25 }
 0x100   : > { %v1568_v24 = vpop.eup %1567  ;;  %v759_v29 = vadd.f32 1.0, %v1566_v47  ;;  %1593 = vpow2.f32 %v1441_v1  ;;  %1224 = vst [vmem:[%s2537_s27 + $0xc0] sm:$0xff] %v1091_v48  ;;  %1225 = vst.msk [vmem:[%s2537_s27 + $0xc8] sm:$0xff] %vm1200_vm1, %v1092_v57  ;;  %v442_v11 = vpop.xlane.xlu1 %441 }
 0x101   : > { %v1570_v36 = vpop.eup %1569  ;;  %v1097_v37 = vmul.f32 %v1568_v24, %v2227_v38  ;;  %v1098_v9 = vmul.f32 %v1568_v24, %v2230_v43  ;;  %1595 = vrcp.f32 %v760_v59  ;;  %v439_v30 = vpop.xlane.xlu0 %438  ;;  %v1446_v38 = vmul.f32 -1.442695, %v442_v11 }
 0x102   : > { %v1572_v53 = vpop.eup %1571  ;;  %v1095_v28 = vmul.f32 %v1570_v36, %v2233_v44  ;;  %v1096_v33 = vmul.f32 %v1570_v36, %v2236_v45  ;;  %1597 = vrcp.f32 %v759_v29  ;;  %v1445_v49 = vmul.f32 -1.442695, %v439_v30 }
 0x103   : > { %v1574_v50 = vpop.eup %1573  ;;  %v1101_v31 = vmul.f32 %v1572_v53, %v2241_v55  ;;  %v1102_v51 = vmul.f32 %v1572_v53, %v2244_v4  ;;  %1599 = vpow2.f32 %v1444_v26  ;;  %1230 = vst [vmem:[%s2537_s27 + $0xf0] sm:$0xff] %v1097_v37  ;;  %1231 = vst.msk [vmem:[%s2537_s27 + $0xf8] sm:$0xff] %vm1200_vm1, %v1098_v9 }
 0x104   : > { %v1576_v43 = vpop.eup %1575  ;;  %v1099_v44 = vmul.f32 %v1574_v50, %v2247_v6  ;;  %v1100_v45 = vmul.f32 %v1574_v50, %v2250_v7  ;;  %1601 = vpow2.f32 %v1443_v32  ;;  %1228 = vst [vmem:[%s2537_s27 + $0xe0] sm:$0xff] %v1095_v28  ;;  %1229 = vst.msk [vmem:[%s2537_s27 + $0xe8] sm:$0xff] %vm1200_vm1, %v1096_v33  ;;  %v448_v52 = vpop.xlane.xlu1 %447 }
 0x105   : > { %v1578_v55 = vpop.eup %1577  ;;  %v762_v4 = vadd.f32 1.0, %v1576_v43  ;;  %1603 = vpow2.f32 %v1446_v38  ;;  %1234 = vst [vmem:[%s2537_s27 + $0x110] sm:$0xff] %v1101_v31  ;;  %1235 = vst.msk [vmem:[%s2537_s27 + $0x118] sm:$0xff] %vm1200_vm1, %v1102_v51  ;;  %v445_v6 = vpop.xlane.xlu0 %444  ;;  %v1448_v60 = vmul.f32 -1.442695, %v448_v52  ;;  %v2971_v31 = vld [vmem:[#allocation2_spill] sm:$0xff] }
 0x106   : > { %v1580_v10 = vpop.eup %1579  ;;  %v761_v0 = vadd.f32 1.0, %v1578_v55  ;;  %1605 = vpow2.f32 %v1445_v49  ;;  %1232 = vst [vmem:[%s2537_s27 + $0x100] sm:$0xff] %v1099_v44  ;;  %1233 = vst.msk [vmem:[%s2537_s27 + $0x108] sm:$0xff] %vm1200_vm1, %v1100_v45  ;;  %v1447_v5 = vmul.f32 -1.442695, %v445_v6  ;;  %v2972_v43 = vld [vmem:[#allocation3_spill] sm:$0xff] }
 0x107   : > { %v1582_v7 = vpop.eup %1581  ;;  %v1105_v12 = vmul.f32 %v1580_v10, %v2253_v15  ;;  %v1106_v13 = vmul.f32 %v1580_v10, %v2256_v16  ;;  %1607 = vrcp.f32 %v762_v4  ;;  %v2973_v45 = vld [vmem:[#allocation4_spill] sm:$0xff] }
 0x108   : > { %v1584_v61 = vpop.eup %1583  ;;  %v1103_v18 = vmul.f32 %v1582_v7, %v2259_v17  ;;  %v1104_v62 = vmul.f32 %v1582_v7, %v2262_v23  ;;  %1609 = vrcp.f32 %v761_v0  ;;  %v454_v16 = vpop.xlane.xlu1 %453 }
 0x109   : > { %v1586_v63 = vpop.eup %1585  ;;  %v764_v22 = vadd.f32 1.0, %v1584_v61  ;;  %1611 = vpow2.f32 %v1448_v60  ;;  %1238 = vst [vmem:[%s2537_s27 + $0x130] sm:$0xff] %v1105_v12  ;;  %1239 = vst.msk [vmem:[%s2537_s27 + $0x138] sm:$0xff] %vm1200_vm1, %v1106_v13  ;;  %v451_v40 = vpop.xlane.xlu0 %450  ;;  %v1450_v19 = vmul.f32 -1.442695, %v454_v16  ;;  %v2974_v13 = vld [vmem:[#allocation5_spill] sm:$0xff] }
 0x10a   : > { %v1588_v15 = vpop.eup %1587  ;;  %v763_v54 = vadd.f32 1.0, %v1586_v63  ;;  %1613 = vpow2.f32 %v1447_v5  ;;  %1236 = vst [vmem:[%s2537_s27 + $0x120] sm:$0xff] %v1103_v18  ;;  %1237 = vst.msk [vmem:[%s2537_s27 + $0x128] sm:$0xff] %vm1200_vm1, %v1104_v62  ;;  %v1449_v25 = vmul.f32 -1.442695, %v451_v40  ;;  %v2975_v61 = vld [vmem:[#allocation6_spill] sm:$0xff] }
 0x10b   : > { %v1590_v17 = vpop.eup %1589  ;;  %v1109_v23 = vmul.f32 %v1588_v15, %v2265_v27  ;;  %v1110_v14 = vmul.f32 %v1588_v15, %v2268_v34  ;;  %1615 = vrcp.f32 %v764_v22  ;;  %v2976_v5 = vld [vmem:[#allocation7_spill] sm:$0xff]  ;;  %v2977_v22 = vld [vmem:[#allocation8_spill] sm:$0xff] }
 0x10c   : > { %v1592_v1 = vpop.eup %1591  ;;  %v1107_v20 = vmul.f32 %v1590_v17, %v2271_v35  ;;  %v1108_v21 = vmul.f32 %v1590_v17, %v2274_v39  ;;  %1617 = vrcp.f32 %v763_v54  ;;  %v460_v34 = vpop.xlane.xlu1 %459 }
 0x10d   : > { %v1594_v2 = vpop.eup %1593  ;;  %v766_v48 = vadd.f32 1.0, %v1592_v1  ;;  %1619 = vpow2.f32 %v1450_v19  ;;  %1242 = vst [vmem:[%s2537_s27 + $0x150] sm:$0xff] %v1109_v23  ;;  %1243 = vst.msk [vmem:[%s2537_s27 + $0x158] sm:$0xff] %vm1200_vm1, %v1110_v14  ;;  %v457_v3 = vpop.xlane.xlu0 %456  ;;  %v1452_v47 = vmul.f32 -1.442695, %v460_v34 }
 0x10e   : > { %v1596_v27 = vpop.eup %1595  ;;  %v765_v57 = vadd.f32 1.0, %v1594_v2  ;;  %1621 = vpow2.f32 %v1449_v25  ;;  %1240 = vst [vmem:[%s2537_s27 + $0x140] sm:$0xff] %v1107_v20  ;;  %1241 = vst.msk [vmem:[%s2537_s27 + $0x148] sm:$0xff] %vm1200_vm1, %v1108_v21  ;;  %v1451_v29 = vmul.f32 -1.442695, %v457_v3  ;;  %v2978_v21 = vld [vmem:[#allocation9_spill] sm:$0xff] }
 0x10f   : > { %v1598_v35 = vpop.eup %1597  ;;  %v1113_v39 = vmul.f32 %v1596_v27, %v2277_v41  ;;  %v1114_v8 = vmul.f32 %v1596_v27, %v2280_v42  ;;  %1623 = vrcp.f32 %v766_v48  ;;  %v2979_v2 = vld [vmem:[#allocation10_spill] sm:$0xff]  ;;  %v2981_v3 = vld [vmem:[#allocation12_spill] sm:$0xff] }
 0x110   : > { %v1600_v59 = vpop.eup %1599  ;;  %v1111_v26 = vmul.f32 %v1598_v35, %v2283_v46  ;;  %v1112_v24 = vmul.f32 %v1598_v35, %v2286_v58  ;;  %1625 = vrcp.f32 %v765_v57  ;;  %v466_v42 = vpop.xlane.xlu1 %465  ;;  %v2980_v57 = vld [vmem:[#allocation11_spill] sm:$0xff] }
 0x111   : > { %v1602_v32 = vpop.eup %1601  ;;  %v768_v36 = vadd.f32 1.0, %v1600_v59  ;;  %1627 = vpow2.f32 %v1452_v47  ;;  %1246 = vst [vmem:[%s2537_s27 + $0x170] sm:$0xff] %v1113_v39  ;;  %1247 = vst.msk [vmem:[%s2537_s27 + $0x178] sm:$0xff] %vm1200_vm1, %v1114_v8  ;;  %v463_v9 = vpop.xlane.xlu0 %462  ;;  %v1454_v58 = vmul.f32 -1.442695, %v466_v42  ;;  %v2983_v42 = vld [vmem:[#allocation14_spill] sm:$0xff] }
 0x112   : > { %v1604_v41 = vpop.eup %1603  ;;  %v767_v37 = vadd.f32 1.0, %v1602_v32  ;;  %1629 = vpow2.f32 %v1451_v29  ;;  %1244 = vst [vmem:[%s2537_s27 + $0x160] sm:$0xff] %v1111_v26  ;;  %1245 = vst.msk [vmem:[%s2537_s27 + $0x168] sm:$0xff] %vm1200_vm1, %v1112_v24  ;;  %v1453_v11 = vmul.f32 -1.442695, %v463_v9 }
 0x113   : > { %v1606_v53 = vpop.eup %1605  ;;  %1631 = vrcp.f32 %v768_v36  ;;  %v770_v46 = vadd.f32 1.0, %v1604_v41  ;;  %v2982_v41 = vld [vmem:[#allocation13_spill] sm:$0xff] }
 0x114   : > { %v1608_v28 = vpop.eup %1607  ;;  %1633 = vrcp.f32 %v767_v37  ;;  %v769_v33 = vadd.f32 1.0, %v1606_v53  ;;  %v472_v55 = vpop.xlane.xlu1 %471 }
 0x115   : > { %v1610_v30 = vpop.eup %1609  ;;  %v1117_v50 = vmul.f32 %v1608_v28, %v2289_v56  ;;  %v1118_v51 = vmul.f32 %v1608_v28, %v2971_v31  ;;  %1635 = vrcp.f32 %v770_v46  ;;  %v469_v4 = vpop.xlane.xlu0 %468  ;;  %v1456_v52 = vmul.f32 -1.442695, %v472_v55  ;;  %v2984_v46 = vld [vmem:[#allocation15_spill] sm:$0xff]  ;;  %v2985_v28 = vld [vmem:[#allocation16_spill] sm:$0xff]  ;;  %v2986_v31 = vld [vmem:[#allocation17_spill] sm:$0xff] }
 0x116   : > { %v1612_v38 = vpop.eup %1611  ;;  %v1115_v44 = vmul.f32 %v1610_v30, %v2972_v43  ;;  %v1116_v49 = vmul.f32 %v1610_v30, %v2973_v45  ;;  %1637 = vrcp.f32 %v769_v33  ;;  %v1455_v7 = vmul.f32 -1.442695, %v469_v4  ;;  %v2989_v4 = vld [vmem:[#allocation20_spill] sm:$0xff] }
 0x117   : > { %v1614_v10 = vpop.eup %1613  ;;  %v772_v0 = vadd.f32 1.0, %v1612_v38  ;;  %1639 = vpow2.f32 %v1454_v58  ;;  %1250 = vst [vmem:[%s2537_s27 + $0x190] sm:$0xff] %v1117_v50  ;;  %1251 = vst.msk [vmem:[%s2537_s27 + $0x198] sm:$0xff] %vm1200_vm1, %v1118_v51  ;;  %v2987_v38 = vld [vmem:[#allocation18_spill] sm:$0xff] }
 0x118   : > { %v1616_v56 = vpop.eup %1615  ;;  %v771_v6 = vadd.f32 1.0, %v1614_v10  ;;  %1641 = vpow2.f32 %v1453_v11  ;;  %1248 = vst [vmem:[%s2537_s27 + $0x180] sm:$0xff] %v1115_v44  ;;  %1249 = vst.msk [vmem:[%s2537_s27 + $0x188] sm:$0xff] %vm1200_vm1, %v1116_v49  ;;  %v478_v54 = vpop.xlane.xlu1 %477  ;;  %v2988_v49 = vld [vmem:[#allocation19_spill] sm:$0xff] }
 0x119   : > { %v1618_v12 = vpop.eup %1617  ;;  %v1121_v60 = vmul.f32 %v1616_v56, %v2974_v13  ;;  %v1122_v18 = vmul.f32 %v1616_v56, %v2975_v61  ;;  %1643 = vrcp.f32 %v772_v0  ;;  %v475_v16 = vpop.xlane.xlu0 %474  ;;  %v1458_v23 = vmul.f32 -1.442695, %v478_v54  ;;  %v2990_v61 = vld [vmem:[#allocation21_spill] sm:$0xff] }
 0x11a   : > { %v1620_v62 = vpop.eup %1619  ;;  %v1119_v63 = vmul.f32 %v1618_v12, %v2976_v5  ;;  %v1120_v15 = vmul.f32 %v1618_v12, %v2977_v22  ;;  %1645 = vrcp.f32 %v771_v6  ;;  %v1457_v1 = vmul.f32 -1.442695, %v475_v16  ;;  %v2993_v16 = vld [vmem:[#allocation24_spill] sm:$0xff] }
 0x11b   : > { %v1622_v40 = vpop.eup %1621  ;;  %v774_v17 = vadd.f32 1.0, %v1620_v62  ;;  %1647 = vpow2.f32 %v1456_v52  ;;  %1254 = vst [vmem:[%s2537_s27 + $0x1b0] sm:$0xff] %v1121_v60  ;;  %1255 = vst.msk [vmem:[%s2537_s27 + $0x1b8] sm:$0xff] %vm1200_vm1, %v1122_v18  ;;  %v2991_v62 = vld [vmem:[#allocation22_spill] sm:$0xff] }
 0x11c   : > { %v1624_v14 = vpop.eup %1623  ;;  %v773_v19 = vadd.f32 1.0, %v1622_v40  ;;  %1649 = vpow2.f32 %v1455_v7  ;;  %1252 = vst [vmem:[%s2537_s27 + $0x1a0] sm:$0xff] %v1119_v63  ;;  %1253 = vst.msk [vmem:[%s2537_s27 + $0x1a8] sm:$0xff] %vm1200_vm1, %v1120_v15  ;;  %v484_v39 = vpop.xlane.xlu1 %483  ;;  %v2992_v15 = vld [vmem:[#allocation23_spill] sm:$0xff] }
 0x11d   : > { %v1626_v20 = vpop.eup %1625  ;;  %v1125_v25 = vmul.f32 %v1624_v14, %v2978_v21  ;;  %v1126_v48 = vmul.f32 %v1624_v14, %v2979_v2  ;;  %1651 = vrcp.f32 %v774_v17  ;;  %v481_v8 = vpop.xlane.xlu0 %480  ;;  %v1460_v26 = vmul.f32 -1.442695, %v484_v39  ;;  %v2994_v2 = vld [vmem:[#allocation25_spill] sm:$0xff] }
 0x11e   : > { %v1628_v27 = vpop.eup %1627  ;;  %v1123_v34 = vmul.f32 %v1626_v20, %v2980_v57  ;;  %v1124_v35 = vmul.f32 %v1626_v20, %v2981_v3  ;;  %1653 = vrcp.f32 %v773_v19  ;;  %v1459_v32 = vmul.f32 -1.442695, %v481_v8  ;;  %v2997_v8 = vld [vmem:[#allocation28_spill] sm:$0xff] }
 0x11f   : > { %v1630_v47 = vpop.eup %1629  ;;  %v776_v59 = vadd.f32 1.0, %v1628_v27  ;;  %1655 = vpow2.f32 %v1458_v23  ;;  %1258 = vst [vmem:[%s2537_s27 + $0x1d0] sm:$0xff] %v1125_v25  ;;  %1259 = vst.msk [vmem:[%s2537_s27 + $0x1d8] sm:$0xff] %vm1200_vm1, %v1126_v48  ;;  %v2995_v27 = vld [vmem:[#allocation26_spill] sm:$0xff] }
 0x120   : > { %v1632_v24 = vpop.eup %1631  ;;  %v775_v29 = vadd.f32 1.0, %v1630_v47  ;;  %1657 = vpow2.f32 %v1457_v1  ;;  %1256 = vst [vmem:[%s2537_s27 + $0x1c0] sm:$0xff] %v1123_v34  ;;  %1257 = vst.msk [vmem:[%s2537_s27 + $0x1c8] sm:$0xff] %vm1200_vm1, %v1124_v35  ;;  %v490_v11 = vpop.xlane.xlu1 %489  ;;  %v2996_v35 = vld [vmem:[#allocation27_spill] sm:$0xff] }
 0x121   : > { %v1634_v36 = vpop.eup %1633  ;;  %v1129_v37 = vmul.f32 %v1632_v24, %v2982_v41  ;;  %v1130_v9 = vmul.f32 %v1632_v24, %v2983_v42  ;;  %1659 = vrcp.f32 %v776_v59  ;;  %v487_v30 = vpop.xlane.xlu0 %486  ;;  %v1462_v44 = vmul.f32 -1.442695, %v490_v11  ;;  %v2998_v42 = vld [vmem:[#allocation29_spill] sm:$0xff] }
 0x122   : > { %v1636_v53 = vpop.eup %1635  ;;  %v1127_v58 = vmul.f32 %v1634_v36, %v2984_v46  ;;  %v1128_v33 = vmul.f32 %v1634_v36, %v2985_v28  ;;  %1661 = vrcp.f32 %v775_v29  ;;  %v1461_v0 = vmul.f32 -1.442695, %v487_v30  ;;  %v3001_v30 = vld [vmem:[#allocation32_spill] sm:$0xff] }
 0x123   : > { %v1638_v50 = vpop.eup %1637  ;;  %v1133_v51 = vmul.f32 %v1636_v53, %v2986_v31  ;;  %v1134_v43 = vmul.f32 %v1636_v53, %v2987_v38  ;;  %1663 = vpow2.f32 %v1460_v26  ;;  %1262 = vst [vmem:[%s2537_s27 + $0x1f0] sm:$0xff] %v1129_v37  ;;  %1263 = vst.msk [vmem:[%s2537_s27 + $0x1f8] sm:$0xff] %vm1200_vm1, %v1130_v9  ;;  %v2999_v53 = vld [vmem:[#allocation30_spill] sm:$0xff] }
 0x124   : > { %v1640_v45 = vpop.eup %1639  ;;  %v1131_v55 = vmul.f32 %v1638_v50, %v2988_v49  ;;  %v1132_v10 = vmul.f32 %v1638_v50, %v2989_v4  ;;  %1665 = vpow2.f32 %v1459_v32  ;;  %1260 = vst [vmem:[%s2537_s27 + $0x1e0] sm:$0xff] %v1127_v58  ;;  %1261 = vst.msk [vmem:[%s2537_s27 + $0x1e8] sm:$0xff] %vm1200_vm1, %v1128_v33  ;;  %v496_v12 = vpop.xlane.xlu1 %495  ;;  %v3000_v33 = vld [vmem:[#allocation31_spill] sm:$0xff] }
 0x125   : > { %v1642_v52 = vpop.eup %1641  ;;  %v778_v56 = vadd.f32 1.0, %v1640_v45  ;;  %1667 = vpow2.f32 %v1462_v44  ;;  %1266 = vst [vmem:[%s2537_s27 + $0x210] sm:$0xff] %v1133_v51  ;;  %1267 = vst.msk [vmem:[%s2537_s27 + $0x218] sm:$0xff] %vm1200_vm1, %v1134_v43  ;;  %v493_v13 = vpop.xlane.xlu0 %492  ;;  %v1464_v63 = vmul.f32 -1.442695, %v496_v12 }
 0x126   : > { %v1644_v6 = vpop.eup %1643  ;;  %v777_v7 = vadd.f32 1.0, %v1642_v52  ;;  %1669 = vpow2.f32 %v1461_v0  ;;  %1264 = vst [vmem:[%s2537_s27 + $0x200] sm:$0xff] %v1131_v55  ;;  %1265 = vst.msk [vmem:[%s2537_s27 + $0x208] sm:$0xff] %vm1200_vm1, %v1132_v10  ;;  %v1463_v17 = vmul.f32 -1.442695, %v493_v13  ;;  %v3003_v13 = vld [vmem:[#allocation34_spill] sm:$0xff] }
 0x127   : > { %v1646_v60 = vpop.eup %1645  ;;  %v1137_v18 = vmul.f32 %v1644_v6, %v2990_v61  ;;  %v1138_v5 = vmul.f32 %v1644_v6, %v2991_v62  ;;  %1671 = vrcp.f32 %v778_v56 }
 0x128   : > { %v1648_v22 = vpop.eup %1647  ;;  %v1135_v54 = vmul.f32 %v1646_v60, %v2992_v15  ;;  %v1136_v40 = vmul.f32 %v1646_v60, %v2993_v16  ;;  %1673 = vrcp.f32 %v777_v7  ;;  %v502_v20 = vpop.xlane.xlu1 %501  ;;  %v3002_v7 = vld [vmem:[#allocation33_spill] sm:$0xff] }
 0x129   : > { %v1650_v23 = vpop.eup %1649  ;;  %v780_v14 = vadd.f32 1.0, %v1648_v22  ;;  %1675 = vpow2.f32 %v1464_v63  ;;  %1270 = vst [vmem:[%s2537_s27 + $0x230] sm:$0xff] %v1137_v18  ;;  %1271 = vst.msk [vmem:[%s2537_s27 + $0x238] sm:$0xff] %vm1200_vm1, %v1138_v5  ;;  %v499_v21 = vpop.xlane.xlu0 %498  ;;  %v1466_v34 = vmul.f32 -1.442695, %v502_v20  ;;  %v3004_v18 = vld [vmem:[#allocation35_spill] sm:$0xff] }
 0x12a   : > { %v1652_v19 = vpop.eup %1651  ;;  %v779_v1 = vadd.f32 1.0, %v1650_v23  ;;  %1677 = vpow2.f32 %v1463_v17  ;;  %1268 = vst [vmem:[%s2537_s27 + $0x220] sm:$0xff] %v1135_v54  ;;  %1269 = vst.msk [vmem:[%s2537_s27 + $0x228] sm:$0xff] %vm1200_vm1, %v1136_v40  ;;  %v1465_v59 = vmul.f32 -1.442695, %v499_v21  ;;  %v3005_v5 = vld [vmem:[#allocation36_spill] sm:$0xff] }
 0x12b   : > { %v1654_v25 = vpop.eup %1653  ;;  %v1141_v48 = vmul.f32 %v1652_v19, %v2994_v2  ;;  %v1142_v57 = vmul.f32 %v1652_v19, %v2995_v27  ;;  %1679 = vrcp.f32 %v780_v14  ;;  %v3007_v21 = vld [vmem:[#allocation38_spill] sm:$0xff] }
 0x12c   : > { %v1656_v3 = vpop.eup %1655  ;;  %v1139_v39 = vmul.f32 %v1654_v25, %v2996_v35  ;;  %v1140_v47 = vmul.f32 %v1654_v25, %v2997_v8  ;;  %1681 = vrcp.f32 %v779_v1  ;;  %v508_v36 = vpop.xlane.xlu1 %507  ;;  %v3006_v1 = vld [vmem:[#allocation37_spill] sm:$0xff] }
 0x12d   : > { %v1658_v26 = vpop.eup %1657  ;;  %v782_v24 = vadd.f32 1.0, %v1656_v3  ;;  %1683 = vpow2.f32 %v1466_v34  ;;  %1274 = vst [vmem:[%s2537_s27 + $0x250] sm:$0xff] %v1141_v48  ;;  %1275 = vst.msk [vmem:[%s2537_s27 + $0x258] sm:$0xff] %vm1200_vm1, %v1142_v57  ;;  %v505_v41 = vpop.xlane.xlu0 %504  ;;  %v1468_v58 = vmul.f32 -1.442695, %v508_v36  ;;  %v3008_v48 = vld [vmem:[#allocation39_spill] sm:$0xff] }
 0x12e   : > { %v1660_v29 = vpop.eup %1659  ;;  %v781_v32 = vadd.f32 1.0, %v1658_v26  ;;  %1685 = vpow2.f32 %v1465_v59  ;;  %1272 = vst [vmem:[%s2537_s27 + $0x240] sm:$0xff] %v1139_v39  ;;  %1273 = vst.msk [vmem:[%s2537_s27 + $0x248] sm:$0xff] %vm1200_vm1, %v1140_v47  ;;  %v1467_v31 = vmul.f32 -1.442695, %v505_v41  ;;  %v3009_v57 = vld [vmem:[#allocation40_spill] sm:$0xff] }
 0x12f   : > { %v1662_v37 = vpop.eup %1661  ;;  %v1145_v9 = vmul.f32 %v1660_v29, %v2998_v42  ;;  %v1146_v46 = vmul.f32 %v1660_v29, %v2999_v53  ;;  %1687 = vrcp.f32 %v782_v24  ;;  %v3011_v41 = vld [vmem:[#allocation42_spill] sm:$0xff] }
 0x130   : > { %v1664_v28 = vpop.eup %1663  ;;  %v1143_v11 = vmul.f32 %v1662_v37, %v3000_v33  ;;  %v1144_v50 = vmul.f32 %v1662_v37, %v3001_v30  ;;  %1689 = vrcp.f32 %v781_v32  ;;  %v514_v45 = vpop.xlane.xlu1 %513  ;;  %v3010_v32 = vld [vmem:[#allocation41_spill] sm:$0xff] }
 0x131   : > { %v1666_v51 = vpop.eup %1665  ;;  %v784_v38 = vadd.f32 1.0, %v1664_v28  ;;  %1691 = vpow2.f32 %v1468_v58  ;;  %1278 = vst [vmem:[%s2537_s27 + $0x270] sm:$0xff] %v1145_v9  ;;  %1279 = vst.msk [vmem:[%s2537_s27 + $0x278] sm:$0xff] %vm1200_vm1, %v1146_v46  ;;  %v511_v49 = vpop.xlane.xlu0 %510  ;;  %v1470_v10 = vmul.f32 -1.442695, %v514_v45  ;;  %v3012_v9 = vld [vmem:[#allocation43_spill] sm:$0xff] }
 0x132   : > { %v1668_v43 = vpop.eup %1667  ;;  %v783_v44 = vadd.f32 1.0, %v1666_v51  ;;  %1693 = vpow2.f32 %v1467_v31  ;;  %1276 = vst [vmem:[%s2537_s27 + $0x260] sm:$0xff] %v1143_v11  ;;  %1277 = vst.msk [vmem:[%s2537_s27 + $0x268] sm:$0xff] %vm1200_vm1, %v1144_v50  ;;  %v1469_v56 = vmul.f32 -1.442695, %v511_v49  ;;  %v3013_v46 = vld [vmem:[#allocation44_spill] sm:$0xff] }
 0x133   : > { %v1670_v55 = vpop.eup %1669  ;;  %1695 = vrcp.f32 %v784_v38  ;;  %v786_v4 = vadd.f32 1.0, %v1668_v43  ;;  %v3015_v49 = vld [vmem:[#allocation46_spill] sm:$0xff] }
 0x134   : > { %v1672_v0 = vpop.eup %1671  ;;  %1697 = vrcp.f32 %v783_v44  ;;  %v785_v52 = vadd.f32 1.0, %v1670_v55  ;;  %v520_v22 = vpop.xlane.xlu1 %519  ;;  %v3014_v44 = vld [vmem:[#allocation45_spill] sm:$0xff] }
 0x135   : > { %v1674_v6 = vpop.eup %1673  ;;  %v1149_v12 = vmul.f32 %v1672_v0, %v3002_v7  ;;  %v1150_v60 = vmul.f32 %v1672_v0, %v3003_v13  ;;  %1699 = vrcp.f32 %v786_v4  ;;  %v517_v15 = vpop.xlane.xlu0 %516  ;;  %v1472_v40 = vmul.f32 -1.442695, %v520_v22  ;;  %v3018_v13 = vld [vmem:[#allocation49_spill] sm:$0xff] }
 0x136   : > { %v1676_v61 = vpop.eup %1675  ;;  %v1147_v62 = vmul.f32 %v1674_v6, %v3004_v18  ;;  %v1148_v63 = vmul.f32 %v1674_v6, %v3005_v5  ;;  %1701 = vrcp.f32 %v785_v52  ;;  %v1471_v14 = vmul.f32 -1.442695, %v517_v15  ;;  %v3017_v52 = vld [vmem:[#allocation48_spill] sm:$0xff] }
 0x137   : > { %v1678_v54 = vpop.eup %1677  ;;  %v788_v16 = vadd.f32 1.0, %v1676_v61  ;;  %1703 = vpow2.f32 %v1470_v10  ;;  %1282 = vst [vmem:[%s2537_s27 + $0x290] sm:$0xff] %v1149_v12  ;;  %1283 = vst.msk [vmem:[%s2537_s27 + $0x298] sm:$0xff] %vm1200_vm1, %v1150_v60  ;;  %v3016_v10 = vld [vmem:[#allocation47_spill] sm:$0xff]  ;;  %v3019_v61 = vld [vmem:[#allocation50_spill] sm:$0xff] }
 0x138   : > { %v1680_v17 = vpop.eup %1679  ;;  %v787_v23 = vadd.f32 1.0, %v1678_v54  ;;  %1705 = vpow2.f32 %v1469_v56  ;;  %1280 = vst [vmem:[%s2537_s27 + $0x280] sm:$0xff] %v1147_v62  ;;  %1281 = vst.msk [vmem:[%s2537_s27 + $0x288] sm:$0xff] %vm1200_vm1, %v1148_v63  ;;  %v526_v3 = vpop.xlane.xlu1 %525  ;;  %v3020_v63 = vld [vmem:[#allocation51_spill] sm:$0xff]  ;;  %v3021_v15 = vld [vmem:[#allocation52_spill] sm:$0xff] }
 0x139   : > { %v1682_v19 = vpop.eup %1681  ;;  %v1153_v20 = vmul.f32 %v1680_v17, %v3006_v1  ;;  %v1154_v25 = vmul.f32 %v1680_v17, %v3007_v21  ;;  %1707 = vrcp.f32 %v788_v16  ;;  %v523_v35 = vpop.xlane.xlu0 %522  ;;  %v1474_v47 = vmul.f32 -1.442695, %v526_v3  ;;  %v3022_v1 = vld [vmem:[#allocation53_spill] sm:$0xff]  ;;  %v3023_v21 = vld [vmem:[#allocation54_spill] sm:$0xff] }
 0x13a   : > { %v1684_v2 = vpop.eup %1683  ;;  %v1151_v27 = vmul.f32 %v1682_v19, %v3008_v48  ;;  %v1152_v34 = vmul.f32 %v1682_v19, %v3009_v57  ;;  %1709 = vrcp.f32 %v787_v23  ;;  %v1473_v24 = vmul.f32 -1.442695, %v523_v35  ;;  %v3024_v48 = vld [vmem:[#allocation55_spill] sm:$0xff]  ;;  %v3025_v57 = vld [vmem:[#allocation56_spill] sm:$0xff] }
 0x13b   : > { %v1686_v39 = vpop.eup %1685  ;;  %v790_v8 = vadd.f32 1.0, %v1684_v2  ;;  %1711 = vpow2.f32 %v1472_v40  ;;  %1286 = vst [vmem:[%s2537_s27 + $0x2b0] sm:$0xff] %v1153_v20  ;;  %1287 = vst.msk [vmem:[%s2537_s27 + $0x2b8] sm:$0xff] %vm1200_vm1, %v1154_v25 }
 0x13c   : > { %v1688_v59 = vpop.eup %1687  ;;  %v789_v26 = vadd.f32 1.0, %v1686_v39  ;;  %1713 = vpow2.f32 %v1471_v14  ;;  %1284 = vst [vmem:[%s2537_s27 + $0x2a0] sm:$0xff] %v1151_v27  ;;  %1285 = vst.msk [vmem:[%s2537_s27 + $0x2a8] sm:$0xff] %vm1200_vm1, %v1152_v34  ;;  %v532_v28 = vpop.xlane.xlu1 %531 }
 0x13d   : > { %v1690_v29 = vpop.eup %1689  ;;  %v1157_v36 = vmul.f32 %v1688_v59, %v3010_v32  ;;  %v1158_v37 = vmul.f32 %v1688_v59, %v3011_v41  ;;  %1715 = vrcp.f32 %v790_v8  ;;  %v529_v33 = vpop.xlane.xlu0 %528  ;;  %v1476_v50 = vmul.f32 -1.442695, %v532_v28  ;;  %v3026_v59 = vld [vmem:[#allocation57_spill] sm:$0xff] }
 0x13e   : > { %v1692_v42 = vpop.eup %1691  ;;  %v1155_v53 = vmul.f32 %v1690_v29, %v3012_v9  ;;  %v1156_v58 = vmul.f32 %v1690_v29, %v3013_v46  ;;  %1717 = vrcp.f32 %v789_v26  ;;  %v1475_v38 = vmul.f32 -1.442695, %v529_v33  ;;  %v3030_v33 = vld [vmem:[#allocation61_spill] sm:$0xff] }
 0x13f   : > { %v1694_v11 = vpop.eup %1693  ;;  %v792_v30 = vadd.f32 1.0, %v1692_v42  ;;  %1719 = vpow2.f32 %v1474_v47  ;;  %1290 = vst [vmem:[%s2537_s27 + $0x2d0] sm:$0xff] %v1157_v36  ;;  %1291 = vst.msk [vmem:[%s2537_s27 + $0x2d8] sm:$0xff] %vm1200_vm1, %v1158_v37  ;;  %v3028_v36 = vld [vmem:[#allocation59_spill] sm:$0xff]  ;;  %v3029_v37 = vld [vmem:[#allocation60_spill] sm:$0xff] }
 0x140   : > { %v1696_v31 = vpop.eup %1695  ;;  %v791_v51 = vadd.f32 1.0, %v1694_v11  ;;  %1721 = vpow2.f32 %v1473_v24  ;;  %1288 = vst [vmem:[%s2537_s27 + $0x2c0] sm:$0xff] %v1155_v53  ;;  %1289 = vst.msk [vmem:[%s2537_s27 + $0x2c8] sm:$0xff] %vm1200_vm1, %v1156_v58  ;;  %v538_v6 = vpop.xlane.xlu1 %537  ;;  %v3027_v24 = vld [vmem:[#allocation58_spill] sm:$0xff] }
 0x141   : > { %v1698_v43 = vpop.eup %1697  ;;  %v1161_v45 = vmul.f32 %v1696_v31, %v3014_v44  ;;  %v1162_v55 = vmul.f32 %v1696_v31, %v3015_v49  ;;  %1723 = vrcp.f32 %v792_v30  ;;  %v535_v7 = vpop.xlane.xlu0 %534  ;;  %v1478_v62 = vmul.f32 -1.442695, %v538_v6  ;;  %v3031_v30 = vld [vmem:[#allocation62_spill] sm:$0xff] }
 0x142   : > { %v1700_v4 = vpop.eup %1699  ;;  %v1159_v0 = vmul.f32 %v1698_v43, %v3016_v10  ;;  %v1160_v56 = vmul.f32 %v1698_v43, %v3017_v52  ;;  %1725 = vrcp.f32 %v791_v51  ;;  %v1477_v16 = vmul.f32 -1.442695, %v535_v7  ;;  %v3032_v51 = vld [vmem:[#allocation63_spill] sm:$0xff]  ;;  %v3033_v43 = vld [vmem:[#allocation64_spill] sm:$0xff]  ;;  %v3034_v7 = vld [vmem:[#allocation65_spill] sm:$0xff] }
 0x143   : > { %v1702_v12 = vpop.eup %1701  ;;  %v1165_v60 = vmul.f32 %v1700_v4, %v3018_v13  ;;  %v1166_v18 = vmul.f32 %v1700_v4, %v3019_v61  ;;  %1727 = vpow2.f32 %v1476_v50  ;;  %1294 = vst [vmem:[%s2537_s27 + $0x2f0] sm:$0xff] %v1161_v45  ;;  %1295 = vst.msk [vmem:[%s2537_s27 + $0x2f8] sm:$0xff] %vm1200_vm1, %v1162_v55  ;;  %v3035_v13 = vld [vmem:[#allocation66_spill] sm:$0xff]  ;;  %v3036_v61 = vld [vmem:[#allocation67_spill] sm:$0xff] }
 0x144   : > { %v1704_v5 = vpop.eup %1703  ;;  %v1163_v22 = vmul.f32 %v1702_v12, %v3020_v63  ;;  %v1164_v54 = vmul.f32 %v1702_v12, %v3021_v15  ;;  %1729 = vpow2.f32 %v1475_v38  ;;  %1292 = vst [vmem:[%s2537_s27 + $0x2e0] sm:$0xff] %v1159_v0  ;;  %1293 = vst.msk [vmem:[%s2537_s27 + $0x2e8] sm:$0xff] %vm1200_vm1, %v1160_v56  ;;  %v3038_v15 = vld [vmem:[#allocation69_spill] sm:$0xff] }
 0x145   : > { %v1706_v40 = vpop.eup %1705  ;;  %v794_v17 = vadd.f32 1.0, %v1704_v5  ;;  %1731 = vpow2.f32 %v1478_v62  ;;  %1298 = vst [vmem:[%s2537_s27 + $0x310] sm:$0xff] %v1165_v60  ;;  %1299 = vst.msk [vmem:[%s2537_s27 + $0x318] sm:$0xff] %vm1200_vm1, %v1166_v18  ;;  %v3037_v62 = vld [vmem:[#allocation68_spill] sm:$0xff] }
 0x146   : > { %v1708_v23 = vpop.eup %1707  ;;  %v793_v14 = vadd.f32 1.0, %v1706_v40  ;;  %1296 = vst [vmem:[%s2537_s27 + $0x300] sm:$0xff] %v1163_v22  ;;  %1297 = vst.msk [vmem:[%s2537_s27 + $0x308] sm:$0xff] %vm1200_vm1, %v1164_v54  ;;  %1733 = vpow2.f32 %v1477_v16  ;;  %v3039_v16 = vld [vmem:[#allocation70_spill] sm:$0xff] }
 0x147   : > { %v1710_v19 = vpop.eup %1709  ;;  %v1169_v20 = vmul.f32 %v1708_v23, %v3022_v1  ;;  %v1170_v25 = vmul.f32 %v1708_v23, %v3023_v21  ;;  %1735 = vrcp.f32 %v794_v17  ;;  %v3040_v17 = vld [vmem:[#allocation71_spill] sm:$0xff]  ;;  %v3042_v21 = vld [vmem:[#allocation73_spill] sm:$0xff] }
 0x148   : > { %v1712_v2 = vpop.eup %1711  ;;  %v1167_v27 = vmul.f32 %v1710_v19, %v3024_v48  ;;  %v1168_v34 = vmul.f32 %v1710_v19, %v3025_v57  ;;  %1737 = vrcp.f32 %v793_v14  ;;  %v3041_v14 = vld [vmem:[#allocation72_spill] sm:$0xff] }
 0x149   : > { %v1714_v3 = vpop.eup %1713  ;;  %v796_v35 = vadd.f32 1.0, %v1712_v2  ;;  %1302 = vst [vmem:[%s2537_s27 + $0x330] sm:$0xff] %v1169_v20  ;;  %1303 = vst.msk [vmem:[%s2537_s27 + $0x338] sm:$0xff] %vm1200_vm1, %v1170_v25  ;;  %v3043_v2 = vld [vmem:[#allocation74_spill] sm:$0xff] }
 0x14a   : > { %v1716_v39 = vpop.eup %1715  ;;  %v795_v8 = vadd.f32 1.0, %v1714_v3  ;;  %1300 = vst [vmem:[%s2537_s27 + $0x320] sm:$0xff] %v1167_v27  ;;  %1301 = vst.msk [vmem:[%s2537_s27 + $0x328] sm:$0xff] %vm1200_vm1, %v1168_v34  ;;  %v3044_v27 = vld [vmem:[#allocation75_spill] sm:$0xff]  ;;  %v3045_v34 = vld [vmem:[#allocation76_spill] sm:$0xff] }
 0x14b   : > { %v1718_v47 = vpop.eup %1717  ;;  %v1173_v26 = vmul.f32 %v1716_v39, %v3026_v59  ;;  %v1174_v29 = vmul.f32 %v1716_v39, %v3027_v24  ;;  %1739 = vrcp.f32 %v796_v35  ;;  %v3047_v59 = vld [vmem:[#allocation78_spill] sm:$0xff] }
 0x14c   : > { %v1720_v32 = vpop.eup %1719  ;;  %v1171_v41 = vmul.f32 %v1718_v47, %v3028_v36  ;;  %v1172_v42 = vmul.f32 %v1718_v47, %v3029_v37  ;;  %1741 = vrcp.f32 %v795_v8  ;;  %v3046_v8 = vld [vmem:[#allocation77_spill] sm:$0xff]  ;;  %v3049_v36 = vld [vmem:[#allocation80_spill] sm:$0xff] }
 0x14d   : > { %v1722_v9 = vpop.eup %1721  ;;  %v798_v53 = vadd.f32 1.0, %v1720_v32  ;;  %1306 = vst [vmem:[%s2537_s27 + $0x350] sm:$0xff] %v1173_v26  ;;  %1307 = vst.msk [vmem:[%s2537_s27 + $0x358] sm:$0xff] %vm1200_vm1, %v1174_v29  ;;  %v3048_v29 = vld [vmem:[#allocation79_spill] sm:$0xff] }
 0x14e   : > { %v1724_v46 = vpop.eup %1723  ;;  %v797_v58 = vadd.f32 1.0, %v1722_v9  ;;  %1304 = vst [vmem:[%s2537_s27 + $0x340] sm:$0xff] %v1171_v41  ;;  %1305 = vst.msk [vmem:[%s2537_s27 + $0x348] sm:$0xff] %vm1200_vm1, %v1172_v42  ;;  %v3050_v42 = vld [vmem:[#allocation81_spill] sm:$0xff] }
 0x14f   : > { %v1726_v28 = vpop.eup %1725  ;;  %v1177_v11 = vmul.f32 %v1724_v46, %v3030_v33  ;;  %v1178_v50 = vmul.f32 %v1724_v46, %v3031_v30  ;;  %1743 = vrcp.f32 %v798_v53  ;;  %v3051_v53 = vld [vmem:[#allocation82_spill] sm:$0xff]  ;;  %v3053_v33 = vld [vmem:[#allocation84_spill] sm:$0xff] }
 0x150   : > { %v1728_v31 = vpop.eup %1727  ;;  %v1175_v38 = vmul.f32 %v1726_v28, %v3032_v51  ;;  %v1176_v44 = vmul.f32 %v1726_v28, %v3033_v43  ;;  %1745 = vrcp.f32 %v797_v58  ;;  %v3052_v58 = vld [vmem:[#allocation83_spill] sm:$0xff] }
 0x151   : > { %v1730_v45 = vpop.eup %1729  ;;  %v800_v49 = vadd.f32 1.0, %v1728_v31  ;;  %1310 = vst [vmem:[%s2537_s27 + $0x370] sm:$0xff] %v1177_v11  ;;  %1311 = vst.msk [vmem:[%s2537_s27 + $0x378] sm:$0xff] %vm1200_vm1, %v1178_v50 }
 0x152   : > { %v1732_v55 = vpop.eup %1731  ;;  %v799_v4 = vadd.f32 1.0, %v1730_v45  ;;  %1308 = vst [vmem:[%s2537_s27 + $0x360] sm:$0xff] %v1175_v38  ;;  %1309 = vst.msk [vmem:[%s2537_s27 + $0x368] sm:$0xff] %vm1200_vm1, %v1176_v44 }
 0x153   : > { %v1734_v10 = vpop.eup %1733  ;;  %1747 = vrcp.f32 %v800_v49  ;;  %v802_v0 = vadd.f32 1.0, %v1732_v55 }
 0x154   : > { %v1736_v52 = vpop.eup %1735  ;;  %1749 = vrcp.f32 %v799_v4  ;;  %v801_v56 = vadd.f32 1.0, %v1734_v10 }
 0x155   : > { %v1738_v6 = vpop.eup %1737  ;;  %v1181_v12 = vmul.f32 %v1736_v52, %v3034_v7  ;;  %v1182_v60 = vmul.f32 %v1736_v52, %v3035_v13  ;;  %1751 = vrcp.f32 %v802_v0 }
 0x156   : > { %v1179_v18 = vmul.f32 %v1738_v6, %v3036_v61  ;;  %v1180_v5 = vmul.f32 %v1738_v6, %v3037_v62  ;;  %1753 = vrcp.f32 %v801_v56 }
 0x157   : > { %1314 = vst [vmem:[%s2537_s27 + $0x390] sm:$0xff] %v1181_v12  ;;  %1315 = vst.msk [vmem:[%s2537_s27 + $0x398] sm:$0xff] %vm1200_vm1, %v1182_v60 }
 0x158   : > { %v1740_v63 = vpop.eup %1739  ;;  %1312 = vst [vmem:[%s2537_s27 + $0x380] sm:$0xff] %v1179_v18  ;;  %1313 = vst.msk [vmem:[%s2537_s27 + $0x388] sm:$0xff] %vm1200_vm1, %v1180_v5 }
 0x159   : > { %v1742_v22 = vpop.eup %1741  ;;  %v1185_v54 = vmul.f32 %v1740_v63, %v3038_v15  ;;  %v1186_v40 = vmul.f32 %v1740_v63, %v3039_v16 }
 0x15a   : > { %v1183_v23 = vmul.f32 %v1742_v22, %v3040_v17  ;;  %v1184_v19 = vmul.f32 %v1742_v22, %v3041_v14 }
 0x15b   : > { %1318 = vst [vmem:[%s2537_s27 + $0x3b0] sm:$0xff] %v1185_v54  ;;  %1319 = vst.msk [vmem:[%s2537_s27 + $0x3b8] sm:$0xff] %vm1200_vm1, %v1186_v40 }
 0x15c   : > { %v1744_v1 = vpop.eup %1743  ;;  %1316 = vst [vmem:[%s2537_s27 + $0x3a0] sm:$0xff] %v1183_v23  ;;  %1317 = vst.msk [vmem:[%s2537_s27 + $0x3a8] sm:$0xff] %vm1200_vm1, %v1184_v19 }
 0x15d   : > { %v1746_v20 = vpop.eup %1745  ;;  %v1189_v25 = vmul.f32 %v1744_v1, %v3042_v21  ;;  %v1190_v48 = vmul.f32 %v1744_v1, %v3043_v2 }
 0x15e   : > { %v1187_v57 = vmul.f32 %v1746_v20, %v3044_v27  ;;  %v1188_v3 = vmul.f32 %v1746_v20, %v3045_v34 }
 0x15f   : > { %1322 = vst [vmem:[%s2537_s27 + $0x3d0] sm:$0xff] %v1189_v25  ;;  %1323 = vst.msk [vmem:[%s2537_s27 + $0x3d8] sm:$0xff] %vm1200_vm1, %v1190_v48 }
 0x160   : > { %v1748_v35 = vpop.eup %1747  ;;  %1320 = vst [vmem:[%s2537_s27 + $0x3c0] sm:$0xff] %v1187_v57  ;;  %1321 = vst.msk [vmem:[%s2537_s27 + $0x3c8] sm:$0xff] %vm1200_vm1, %v1188_v3 }
 0x161   : > { %v1750_v39 = vpop.eup %1749  ;;  %v1193_v47 = vmul.f32 %v1748_v35, %v3046_v8  ;;  %v1194_v26 = vmul.f32 %v1748_v35, %v3047_v59 }
 0x162   : > { %v1752_v24 = vpop.eup %1751  ;;  %v1191_v32 = vmul.f32 %v1750_v39, %v3048_v29  ;;  %v1192_v41 = vmul.f32 %v1750_v39, %v3049_v36 }
 0x163   : > { %v1754_v37 = vpop.eup %1753  ;;  %v1197_v9 = vmul.f32 %v1752_v24, %v3050_v42  ;;  %v1198_v46 = vmul.f32 %v1752_v24, %v3051_v53  ;;  %1326 = vst [vmem:[%s2537_s27 + $0x3f0] sm:$0xff] %v1193_v47  ;;  %1327 = vst.msk [vmem:[%s2537_s27 + $0x3f8] sm:$0xff] %vm1200_vm1, %v1194_v26 }
 0x164   : > { %1324 = vst [vmem:[%s2537_s27 + $0x3e0] sm:$0xff] %v1191_v32  ;;  %1325 = vst.msk [vmem:[%s2537_s27 + $0x3e8] sm:$0xff] %vm1200_vm1, %v1192_v41  ;;  %v1195_v28 = vmul.f32 %v1754_v37, %v3052_v58  ;;  %v1196_v11 = vmul.f32 %v1754_v37, %v3053_v33 }
 0x165   : > { %1330 = vst [vmem:[%s2537_s27 + $0x410] sm:$0xff] %v1197_v9  ;;  %1331 = vst.msk [vmem:[%s2537_s27 + $0x418] sm:$0xff] %vm1200_vm1, %v1198_v46 }
 0x166   : > { %1328 = vst [vmem:[%s2537_s27 + $0x400] sm:$0xff] %v1195_v28  ;;  %1329 = vst.msk [vmem:[%s2537_s27 + $0x408] sm:$0xff] %vm1200_vm1, %v1196_v11 }
 0x167 PF: > { %s13_s12 = sadd.s32 1, %s1761_s12  }
 0x168   : > { %p10_p4 = scmp.ge.s32.totalorder %s13_s12, 4  }
 0x16a   :  { %12 = sbr.rel (!%p10_p4) target bundleno = 1 (0x1), region = 65 }

</bundles_post_ra>
